<compile_context>
chip_gen: v7x
topology: tpu7x:2x2x1
jax: 0.10.0
libtpu: 0.0.40
codegen_flags: <defaults>
</compile_context>

<pallas_src>
import functools

import jax
import jax.numpy as jnp
from jax.experimental import pallas as pl
from jax.experimental.pallas import tpu as pltpu

LANE = 128
SUBLANE = 8


def _silu(x):
    return x * jax.nn.sigmoid(x)


def _pad_to(n, m):
    return ((n + m - 1) // m) * m


# ----------------------------------------------------------------------------
# Fused kernel: stem + avg-pool (as matmul) + (estimator ++ classifier) heads
# ----------------------------------------------------------------------------
def _fused_kernel(x_ref, wc_ref, bc_ref,
                  w1_ref, b1_ref, w2_ref, b2_ref, w3_ref, b3_ref,
                  out_ref, *, batch, hw, bp):
    # Stem: pointwise conv as one big matmul over all B*HW pixels + SiLU.
    h = jnp.dot(x_ref[...], wc_ref[...], preferred_element_type=jnp.float32)
    h = _silu(h + bc_ref[...])                                   # (B*HW, Fp)

    # AdaptiveAvgPool2d(1) as an MXU matmul with a block pooling matrix:
    #   pool[b, p] = 1/HW  if  b*HW <= p < (b+1)*HW  else 0
    # Rows b >= batch are all-zero (batch padding to a full sublane tile).
    n = batch * hw
    row = jax.lax.broadcasted_iota(jnp.int32, (bp, n), 0)
    col = jax.lax.broadcasted_iota(jnp.int32, (bp, n), 1)
    in_blk = jnp.logical_and(col >= row * hw, col < (row + 1) * hw)
    pool = jnp.where(in_blk, jnp.float32(1.0 / hw), jnp.float32(0.0))
    feat = jnp.dot(pool, h, preferred_element_type=jnp.float32)  # (bp, Fp)

    # Dropout(p=0.2) is identity in eval mode.

    # Fused heads (BN folded into the linears, block-diagonal weights).
    h1 = _silu(jnp.dot(feat, w1_ref[...],
                       preferred_element_type=jnp.float32) + b1_ref[...])
    h2 = _silu(jnp.dot(h1, w2_ref[...],
                       preferred_element_type=jnp.float32) + b2_ref[...])
    z = jnp.dot(h2, w3_ref[...],
                preferred_element_type=jnp.float32) + b3_ref[...]  # (bp, Op)

    # ReLU applies only to the estimator output (column 0); logits untouched.
    ocol = jax.lax.broadcasted_iota(jnp.int32, z.shape, 1)
    out_ref[...] = jnp.where(ocol == 0, jnp.maximum(z, 0.0), z)


# ----------------------------------------------------------------------------
# Wrapper: layout glue, BN folding, head concatenation, pallas_call
# ----------------------------------------------------------------------------
def efficientnet_based_forward(x_nchw, params):
    B, Cin, H, W = x_nchw.shape
    HW = H * W
    F = params["wc"].shape[1]
    hidden = params["est"]["w1"].shape[1]
    num_classes = params["cls"]["w3"].shape[1]

    Cp = _pad_to(max(Cin, SUBLANE), SUBLANE)  # sublane-aligned contraction dim
    Fp = _pad_to(F, LANE)                     # lane-dense feature dim
    Hp = _pad_to(2 * hidden, LANE)            # lane-dense concat-hidden dim
    Op = _pad_to(1 + num_classes, LANE)       # lane-dense output slab
    Bp = _pad_to(max(B, SUBLANE), SUBLANE)    # sublane-aligned batch rows

    # NCHW -> channels-last flattened (B*HW, Cp), zero-padded channels.
    x_flat = jnp.transpose(x_nchw, (0, 2, 3, 1)).reshape(B * HW, Cin)
    x_pad = jnp.zeros((B * HW, Cp), jnp.float32).at[:, :Cin].set(x_flat)

    # Stem weights, zero-padded to lane-dense shapes.
    wc = jnp.zeros((Cp, Fp), jnp.float32).at[:Cin, :F].set(params["wc"])
    bc = jnp.zeros((1, Fp), jnp.float32).at[:, :F].set(params["bc"])

    # Fold BatchNorm1d (eval) into the preceding Linear:
    #   (x@w + b) * s + sh  ==  x@(w*s) + (b*s + sh)
    def fold(p):
        w1 = p["w1"] * p["s1"]; b1 = p["b1"] * p["s1"] + p["h1"]
        w2 = p["w2"] * p["s2"]; b2 = p["b2"] * p["s2"] + p["h2"]
        return w1, b1, w2, b2, p["w3"], p["b3"]

    ew1, eb1, ew2, eb2, ew3, eb3 = fold(params["est"])
    cw1, cb1, cw2, cb2, cw3, cb3 = fold(params["cls"])

    # Concatenate the two heads into one matmul chain.
    w1 = (jnp.zeros((Fp, Hp), jnp.float32)
          .at[:F, :hidden].set(ew1)
          .at[:F, hidden:2 * hidden].set(cw1))
    b1 = (jnp.zeros((1, Hp), jnp.float32)
          .at[:, :hidden].set(eb1)
          .at[:, hidden:2 * hidden].set(cb1))
    w2 = (jnp.zeros((Hp, Hp), jnp.float32)
          .at[:hidden, :hidden].set(ew2)
          .at[hidden:2 * hidden, hidden:2 * hidden].set(cw2))
    b2 = (jnp.zeros((1, Hp), jnp.float32)
          .at[:, :hidden].set(eb2)
          .at[:, hidden:2 * hidden].set(cb2))
    w3 = (jnp.zeros((Hp, Op), jnp.float32)
          .at[:hidden, 0:1].set(ew3)
          .at[hidden:2 * hidden, 1:1 + num_classes].set(cw3))
    b3 = (jnp.zeros((1, Op), jnp.float32)
          .at[:, 0:1].set(eb3)
          .at[:, 1:1 + num_classes].set(cb3))

    kernel = functools.partial(_fused_kernel, batch=B, hw=HW, bp=Bp)
    vmem = pl.BlockSpec(memory_space=pltpu.MemorySpace.VMEM)

    out = pl.pallas_call(
        kernel,
        out_shape=jax.ShapeDtypeStruct((Bp, Op), jnp.float32),
        in_specs=[vmem] * 9,
        out_specs=vmem,
    )(x_pad, wc, bc, w1, b1, w2, b2, w3, b3)

    weight = out[:B, 0:1]
    logits = out[:B, 1:1 + num_classes]
    return weight, logits


# ----------------------------------------------------------------------------
# Deterministic parameter construction (PyTorch-default-style init)
# ----------------------------------------------------------------------------
def init_params(key, cin, feature_out_size, hidden, num_classes, eps=1e-5):
    ks = iter(jax.random.split(key, 32))

    def linear(fan_in, fan_out):
        bound = 1.0 / (fan_in ** 0.5)
        w = jax.random.uniform(next(ks), (fan_in, fan_out), jnp.float32, -bound, bound)
        b = jax.random.uniform(next(ks), (1, fan_out), jnp.float32, -bound, bound)
        return w, b

    def bn_fold(n):
        gamma = jnp.ones((1, n), jnp.float32)
        beta = jnp.zeros((1, n), jnp.float32)
        running_mean = jnp.zeros((1, n), jnp.float32)
        running_var = jnp.ones((1, n), jnp.float32)
        scale = gamma / jnp.sqrt(running_var + eps)
        shift = beta - running_mean * scale
        return scale, shift

    def make_head(out_features):
        w1, b1 = linear(feature_out_size, hidden)
        s1, h1 = bn_fold(hidden)
        w2, b2 = linear(hidden, hidden)
        s2, h2 = bn_fold(hidden)
        w3, b3 = linear(hidden, out_features)
        return dict(w1=w1, b1=b1, s1=s1, h1=h1,
                    w2=w2, b2=b2, s2=s2, h2=h2,
                    w3=w3, b3=b3)

    est = make_head(1)
    cls = make_head(num_classes)
    wc, bc = linear(cin, feature_out_size)   # synthetic backbone stem
    return dict(wc=wc, bc=bc, est=est, cls=cls)


# ----------------------------------------------------------------------------
# Pure-JAX reference for correctness checking
# ----------------------------------------------------------------------------
def reference_forward(x_nchw, params):
    B, Cin, H, W = x_nchw.shape
    x = jnp.transpose(x_nchw, (0, 2, 3, 1)).reshape(B, H * W, Cin)
    h = jax.nn.silu(jnp.einsum("bpc,cf->bpf", x, params["wc"]) + params["bc"])
    feat = jnp.mean(h, axis=1)

    def head(f, p):
        h1 = jax.nn.silu((f @ p["w1"] + p["b1"]) * p["s1"] + p["h1"])
        h2 = jax.nn.silu((h1 @ p["w2"] + p["b2"]) * p["s2"] + p["h2"])
        return h2 @ p["w3"] + p["b3"]

    w = jnp.maximum(head(feat, params["est"]), 0.0)
    logits = head(feat, params["cls"])
    return w, logits


if __name__ == "__main__":
    B, Cin, H, W = 2, 4, 16, 16
    feature_out_size, linear_hidden_size, num_classes = 32, 32, 5

    key = jax.random.PRNGKey(0)
    kx, kp = jax.random.split(key)
    x = jax.random.normal(kx, (B, Cin, H, W), jnp.float32)
    params = init_params(kp, Cin, feature_out_size, linear_hidden_size, num_classes)

    weight, logits = jax.jit(efficientnet_based_forward)(x, params)
    jax.block_until_ready((weight, logits))

    w_ref, l_ref = reference_forward(x, params)
    assert weight.shape == (B, 1)
    assert logits.shape == (B, num_classes)
    assert jnp.allclose(weight, w_ref, atol=1e-2, rtol=1e-2)
    assert jnp.allclose(logits, l_ref, atol=1e-2, rtol=1e-2)

    print("KERNEL_OK")
</pallas_src>

<mosaic_0001>
module attributes {stable_mosaic.version = 11 : i64} {
  func.func @_fused_kernel(%arg0: memref<512x8xf32, #tpu.memory_space<vmem>>, %arg1: memref<8x128xf32, #tpu.memory_space<vmem>>, %arg2: memref<1x128xf32, #tpu.memory_space<vmem>>, %arg3: memref<128x128xf32, #tpu.memory_space<vmem>>, %arg4: memref<1x128xf32, #tpu.memory_space<vmem>>, %arg5: memref<128x128xf32, #tpu.memory_space<vmem>>, %arg6: memref<1x128xf32, #tpu.memory_space<vmem>>, %arg7: memref<128x128xf32, #tpu.memory_space<vmem>>, %arg8: memref<1x128xf32, #tpu.memory_space<vmem>>, %arg9: memref<8x128xf32, #tpu.memory_space<vmem>>) attributes {dimension_semantics = [], scalar_prefetch = 0 : i64, scratch_operands = 0 : i64, tpu.core_type = #tpu.core_type<tc>} {
    %c0 = arith.constant 0 : index
    %c0_0 = arith.constant 0 : index
    %0 = vector.load %arg0[%c0, %c0_0] : memref<512x8xf32, #tpu.memory_space<vmem>>, vector<512x8xf32>
    %c0_1 = arith.constant 0 : index
    %c0_2 = arith.constant 0 : index
    %1 = vector.load %arg1[%c0_1, %c0_2] : memref<8x128xf32, #tpu.memory_space<vmem>>, vector<8x128xf32>
    %cst = arith.constant dense<0.000000e+00> : vector<512x128xf32>
    %2 = tpu.matmul %0, %1, %cst {dimension_numbers = #tpu.dot_dimension_numbers<[1], [0], [0], [1], [0, 0, 1, 1], [], []>} : vector<512x8xf32>, vector<8x128xf32>, vector<512x128xf32> -> vector<512x128xf32>
    %c0_3 = arith.constant 0 : index
    %c0_4 = arith.constant 0 : index
    %3 = vector.load %arg2[%c0_3, %c0_4] : memref<1x128xf32, #tpu.memory_space<vmem>>, vector<1x128xf32>
    %4 = vector.broadcast %3 : vector<1x128xf32> to vector<512x128xf32>
    %5 = arith.addf %2, %4 : vector<512x128xf32>
    %6 = arith.negf %5 : vector<512x128xf32>
    %7 = math.exp %6 : vector<512x128xf32>
    %cst_5 = arith.constant 1.000000e+00 : f32
    %8 = vector.broadcast %cst_5 : f32 to vector<512x128xf32>
    %9 = arith.addf %8, %7 : vector<512x128xf32>
    %10 = arith.divf %8, %9 : vector<512x128xf32>
    %11 = arith.mulf %5, %10 : vector<512x128xf32>
    %12 = tpu.iota {dimensions = array<i32: 0>} : vector<8x512xi32>
    %13 = tpu.iota {dimensions = array<i32: 1>} : vector<8x512xi32>
    %c256_i32 = arith.constant 256 : i32
    %14 = vector.broadcast %c256_i32 : i32 to vector<8x512xi32>
    %15 = arith.muli %12, %14 : vector<8x512xi32>
    %16 = arith.cmpi sge, %13, %15 : vector<8x512xi32>
    %c1_i32 = arith.constant 1 : i32
    %17 = vector.broadcast %c1_i32 : i32 to vector<8x512xi32>
    %18 = arith.addi %12, %17 : vector<8x512xi32>
    %c256_i32_6 = arith.constant 256 : i32
    %19 = vector.broadcast %c256_i32_6 : i32 to vector<8x512xi32>
    %20 = arith.muli %18, %19 : vector<8x512xi32>
    %21 = arith.cmpi slt, %13, %20 : vector<8x512xi32>
    %22 = arith.andi %16, %21 : vector<8x512xi1>
    %cst_7 = arith.constant 3.906250e-03 : f32
    %cst_8 = arith.constant 0.000000e+00 : f32
    %23 = vector.broadcast %cst_7 : f32 to vector<8x512xf32>
    %24 = vector.broadcast %cst_8 : f32 to vector<8x512xf32>
    %25 = arith.select %22, %23, %24 : vector<8x512xi1>, vector<8x512xf32>
    %cst_9 = arith.constant dense<0.000000e+00> : vector<8x128xf32>
    %26 = tpu.matmul %25, %11, %cst_9 {dimension_numbers = #tpu.dot_dimension_numbers<[1], [0], [0], [1], [0, 0, 1, 1], [], []>} : vector<8x512xf32>, vector<512x128xf32>, vector<8x128xf32> -> vector<8x128xf32>
    %c0_10 = arith.constant 0 : index
    %c0_11 = arith.constant 0 : index
    %27 = vector.load %arg3[%c0_10, %c0_11] : memref<128x128xf32, #tpu.memory_space<vmem>>, vector<128x128xf32>
    %cst_12 = arith.constant dense<0.000000e+00> : vector<8x128xf32>
    %28 = tpu.matmul %26, %27, %cst_12 {dimension_numbers = #tpu.dot_dimension_numbers<[1], [0], [0], [1], [0, 0, 1, 1], [], []>} : vector<8x128xf32>, vector<128x128xf32>, vector<8x128xf32> -> vector<8x128xf32>
    %c0_13 = arith.constant 0 : index
    %c0_14 = arith.constant 0 : index
    %29 = vector.load %arg4[%c0_13, %c0_14] : memref<1x128xf32, #tpu.memory_space<vmem>>, vector<1x128xf32>
    %30 = vector.broadcast %29 : vector<1x128xf32> to vector<8x128xf32>
    %31 = arith.addf %28, %30 : vector<8x128xf32>
    %32 = arith.negf %31 : vector<8x128xf32>
    %33 = math.exp %32 : vector<8x128xf32>
    %cst_15 = arith.constant 1.000000e+00 : f32
    %34 = vector.broadcast %cst_15 : f32 to vector<8x128xf32>
    %35 = arith.addf %34, %33 : vector<8x128xf32>
    %36 = arith.divf %34, %35 : vector<8x128xf32>
    %37 = arith.mulf %31, %36 : vector<8x128xf32>
    %c0_16 = arith.constant 0 : index
    %c0_17 = arith.constant 0 : index
    %38 = vector.load %arg5[%c0_16, %c0_17] : memref<128x128xf32, #tpu.memory_space<vmem>>, vector<128x128xf32>
    %cst_18 = arith.constant dense<0.000000e+00> : vector<8x128xf32>
    %39 = tpu.matmul %37, %38, %cst_18 {dimension_numbers = #tpu.dot_dimension_numbers<[1], [0], [0], [1], [0, 0, 1, 1], [], []>} : vector<8x128xf32>, vector<128x128xf32>, vector<8x128xf32> -> vector<8x128xf32>
    %c0_19 = arith.constant 0 : index
    %c0_20 = arith.constant 0 : index
    %40 = vector.load %arg6[%c0_19, %c0_20] : memref<1x128xf32, #tpu.memory_space<vmem>>, vector<1x128xf32>
    %41 = vector.broadcast %40 : vector<1x128xf32> to vector<8x128xf32>
    %42 = arith.addf %39, %41 : vector<8x128xf32>
    %43 = arith.negf %42 : vector<8x128xf32>
    %44 = math.exp %43 : vector<8x128xf32>
    %cst_21 = arith.constant 1.000000e+00 : f32
    %45 = vector.broadcast %cst_21 : f32 to vector<8x128xf32>
    %46 = arith.addf %45, %44 : vector<8x128xf32>
    %47 = arith.divf %45, %46 : vector<8x128xf32>
    %48 = arith.mulf %42, %47 : vector<8x128xf32>
    %c0_22 = arith.constant 0 : index
    %c0_23 = arith.constant 0 : index
    %49 = vector.load %arg7[%c0_22, %c0_23] : memref<128x128xf32, #tpu.memory_space<vmem>>, vector<128x128xf32>
    %cst_24 = arith.constant dense<0.000000e+00> : vector<8x128xf32>
    %50 = tpu.matmul %48, %49, %cst_24 {dimension_numbers = #tpu.dot_dimension_numbers<[1], [0], [0], [1], [0, 0, 1, 1], [], []>} : vector<8x128xf32>, vector<128x128xf32>, vector<8x128xf32> -> vector<8x128xf32>
    %c0_25 = arith.constant 0 : index
    %c0_26 = arith.constant 0 : index
    %51 = vector.load %arg8[%c0_25, %c0_26] : memref<1x128xf32, #tpu.memory_space<vmem>>, vector<1x128xf32>
    %52 = vector.broadcast %51 : vector<1x128xf32> to vector<8x128xf32>
    %53 = arith.addf %50, %52 : vector<8x128xf32>
    %54 = tpu.iota {dimensions = array<i32: 1>} : vector<8x128xi32>
    %c0_i32 = arith.constant 0 : i32
    %55 = vector.broadcast %c0_i32 : i32 to vector<8x128xi32>
    %56 = arith.cmpi eq, %54, %55 : vector<8x128xi32>
    %cst_27 = arith.constant 0.000000e+00 : f32
    %57 = vector.broadcast %cst_27 : f32 to vector<8x128xf32>
    %58 = arith.maximumf %53, %57 : vector<8x128xf32>
    %59 = arith.select %56, %58, %53 : vector<8x128xi1>, vector<8x128xf32>
    %c0_28 = arith.constant 0 : index
    %c0_29 = arith.constant 0 : index
    %60 = vector.load %arg9[%c0_28, %c0_29] : memref<8x128xf32, #tpu.memory_space<vmem>>, vector<8x128xf32>
    tpu.vector_store %arg9[%c0_28, %c0_29], %59 {strides = array<i32>} : memref<8x128xf32, #tpu.memory_space<vmem>>, vector<8x128xf32>,
    return
  }
}

</mosaic_0001>

<bundles_post_ra>
// kernel: efficientnet_based_forward.1
= control target key start
LH: loop header
LB: loop body
LE: loop exit
PB: predicated region body
PF: predicated region fallthrough
CT: control target
= control target key end

     0   :  { %vm104_vm0 = vcmask 64512   ;;  %vm2531_vm13 = vmmov 0   ;;  %s3538_s1 = inlined_call_operand.vmem [shape: f32[8,128], index: 1, kind: input, shape index: {}]   ;;  %s3539_s0 = inlined_call_operand.vmem [shape: f32[512,8], index: 0, kind: input, shape index: {}]   ;;  %s3540_s2 = inlined_call_operand.vmem [shape: f32[1,128], index: 2, kind: input, shape index: {}]   ;;  %s3541_s3 = inlined_call_operand.vmem [shape: f32[128,128], index: 3, kind: input, shape index: {}]   ;;  %s3542_s5 = inlined_call_operand.vmem [shape: f32[128,128], index: 5, kind: input, shape index: {}]   ;;  %s3543_s7 = inlined_call_operand.vmem [shape: f32[128,128], index: 7, kind: input, shape index: {}]   ;;  %s3544_s4 = inlined_call_operand.vmem [shape: f32[1,128], index: 4, kind: input, shape index: {}]   ;;  %s3545_s6 = inlined_call_operand.vmem [shape: f32[1,128], index: 6, kind: input, shape index: {}]   ;;  %s3546_s8 = inlined_call_operand.vmem [shape: f32[1,128], index: 8, kind: input, shape index: {}]   ;;  %s3547_s9 = inlined_call_operand.vmem [shape: f32[8,128], index: 9, kind: output, shape index: {}]  }
   0x1   :  { %v96_v0 = vld [vmem:[%s3538_s1] sm:$0xff]  ;;  %v33_v2 = vld [vmem:[%s3539_s0 + $0x8] sm:$0xff]  ;;  %v34_v3 = vld [vmem:[%s3539_s0 + $0x10] sm:$0xff] }
   0x2   :  { %v32_v1 = vld [vmem:[%s3539_s0] sm:$0xff]  ;;  %1921 = vmatprep.subr.mxu0 %v96_v0  ;;  %v35_v4 = vld [vmem:[%s3539_s0 + $0x18] sm:$0xff]  ;;  %v37_v6 = vld [vmem:[%s3539_s0 + $0x28] sm:$0xff] }
   0x3   :  { %1923 = vmatprep.mubr.msk.f32.mxu0 %vm104_vm0, %v32_v1  ;;  %1922 = vmatpush3.msra.mxu0 %v96_v0  ;;  %v36_v5 = vld [vmem:[%s3539_s0 + $0x20] sm:$0xff]  ;;  %v38_v7 = vld [vmem:[%s3539_s0 + $0x30] sm:$0xff]  ;;  %v39_v8 = vld [vmem:[%s3539_s0 + $0x38] sm:$0xff]  ;;  %v1130_v1 = vlaneseq }
   0x4   :  { %1924 = vmatmul.mubr.msk.f32.vlgmr.msra.gmra.mrb[0].mxu0 %vm104_vm0, %v33_v2  ;;  %v40_v9 = vld [vmem:[%s3539_s0 + $0x40] sm:$0xff]  ;;  %v41_v10 = vld [vmem:[%s3539_s0 + $0x48] sm:$0xff]  ;;  %v42_v11 = vld [vmem:[%s3539_s0 + $0x50] sm:$0xff] }
   0x5   :  { %1926 = vmatprep.mubr.msk.f32.mxu0 %vm104_vm0, %v34_v3  ;;  %v43_v12 = vld [vmem:[%s3539_s0 + $0x58] sm:$0xff]  ;;  %v44_v13 = vld [vmem:[%s3539_s0 + $0x60] sm:$0xff]  ;;  %v45_v14 = vld [vmem:[%s3539_s0 + $0x68] sm:$0xff]  ;;  %v1131_v2 = vshrl.u32 %v1130_v1, 7 }
   0x6   :  { %v46_v15 = vld [vmem:[%s3539_s0 + $0x70] sm:$0xff]  ;;  %v47_v16 = vld [vmem:[%s3539_s0 + $0x78] sm:$0xff]  ;;  %v48_v17 = vld [vmem:[%s3539_s0 + $0x80] sm:$0xff] }
   0x7   :  { %v49_v18 = vld [vmem:[%s3539_s0 + $0x88] sm:$0xff]  ;;  %v50_v19 = vld [vmem:[%s3539_s0 + $0x90] sm:$0xff]  ;;  %v51_v20 = vld [vmem:[%s3539_s0 + $0x98] sm:$0xff] }
   0x8   :  { %1927 = vmatmul.mubr.msk.f32.gmra.mrb[2].mxu0 %vm104_vm0, %v35_v4  ;;  %v52_v21 = vld [vmem:[%s3539_s0 + $0xa0] sm:$0xff]  ;;  %v53_v22 = vld [vmem:[%s3539_s0 + $0xa8] sm:$0xff]  ;;  %v54_v23 = vld [vmem:[%s3539_s0 + $0xb0] sm:$0xff]  ;;  %v2847_v4 = vand.u32 127, %v1130_v1 }
   0x9   :  { %1929 = vmatprep.mubr.msk.f32.mxu0 %vm104_vm0, %v36_v5  ;;  %v55_v24 = vld [vmem:[%s3539_s0 + $0xb8] sm:$0xff]  ;;  %v56_v25 = vld [vmem:[%s3539_s0 + $0xc0] sm:$0xff]  ;;  %v57_v26 = vld [vmem:[%s3539_s0 + $0xc8] sm:$0xff]  ;;  %v1142_v5 = vadd.s32 1, %v1131_v2 }
   0xa   :  { %v58_v27 = vld [vmem:[%s3539_s0 + $0xd0] sm:$0xff]  ;;  %v59_v28 = vld [vmem:[%s3539_s0 + $0xd8] sm:$0xff]  ;;  %v60_v29 = vld [vmem:[%s3539_s0 + $0xe0] sm:$0xff]  ;;  %vm1589_vm14 = vcmp.eq.s32.totalorder %v2847_v4, 0 }
   0xb   :  { %v61_v30 = vld [vmem:[%s3539_s0 + $0xe8] sm:$0xff]  ;;  %v62_v31 = vld [vmem:[%s3539_s0 + $0xf0] sm:$0xff]  ;;  %v63_v32 = vld [vmem:[%s3539_s0 + $0xf8] sm:$0xff] }
   0xc   :  { %1930 = vmatmul.mubr.msk.f32.gmra.mrb[4].mxu0 %vm104_vm0, %v37_v6  ;;  %v64_v33 = vld [vmem:[%s3539_s0 + $0x100] sm:$0xff]  ;;  %v65_v34 = vld [vmem:[%s3539_s0 + $0x108] sm:$0xff]  ;;  %v66_v35 = vld [vmem:[%s3539_s0 + $0x110] sm:$0xff] }
   0xd   :  { %1932 = vmatprep.mubr.msk.f32.mxu0 %vm104_vm0, %v38_v7  ;;  %v67_v36 = vld [vmem:[%s3539_s0 + $0x118] sm:$0xff]  ;;  %v68_v37 = vld [vmem:[%s3539_s0 + $0x120] sm:$0xff]  ;;  %v69_v38 = vld [vmem:[%s3539_s0 + $0x128] sm:$0xff]  ;;  %v1134_v7 = vadd.s32 128, %v2847_v4 }
   0xe   :  { %v70_v39 = vld [vmem:[%s3539_s0 + $0x130] sm:$0xff]  ;;  %v71_v40 = vld [vmem:[%s3539_s0 + $0x138] sm:$0xff]  ;;  %v72_v41 = vld [vmem:[%s3539_s0 + $0x140] sm:$0xff] }
   0xf   :  { %v73_v42 = vld [vmem:[%s3539_s0 + $0x148] sm:$0xff]  ;;  %v74_v43 = vld [vmem:[%s3539_s0 + $0x150] sm:$0xff]  ;;  %v75_v44 = vld [vmem:[%s3539_s0 + $0x158] sm:$0xff] }
  0x10   :  { %1933 = vmatmul.mubr.msk.f32.gmra.mrb[6].mxu0 %vm104_vm0, %v39_v8  ;;  %v76_v45 = vld [vmem:[%s3539_s0 + $0x160] sm:$0xff]  ;;  %v77_v46 = vld [vmem:[%s3539_s0 + $0x168] sm:$0xff]  ;;  %v78_v47 = vld [vmem:[%s3539_s0 + $0x170] sm:$0xff]  ;;  %v2850_v8 = vmul.u32 256, %v1131_v2 }
  0x11   :  { %1935 = vmatprep.mubr.msk.f32.mxu0 %vm104_vm0, %v40_v9  ;;  %v79_v48 = vld [vmem:[%s3539_s0 + $0x178] sm:$0xff]  ;;  %v80_v49 = vld [vmem:[%s3539_s0 + $0x180] sm:$0xff]  ;;  %v81_v50 = vld [vmem:[%s3539_s0 + $0x188] sm:$0xff]  ;;  %v2852_v9 = vmul.u32 256, %v1142_v5 }
  0x12   :  { %v82_v51 = vld [vmem:[%s3539_s0 + $0x190] sm:$0xff]  ;;  %v83_v52 = vld [vmem:[%s3539_s0 + $0x198] sm:$0xff]  ;;  %v84_v53 = vld [vmem:[%s3539_s0 + $0x1a0] sm:$0xff]  ;;  %vm1139_vm1 = vcmp.ge.s32.totalorder %v1134_v7, %v2850_v8  ;;  %vm1138_vm4 = vcmp.ge.s32.totalorder %v2847_v4, %v2850_v8 }
  0x13   :  { %v85_v54 = vld [vmem:[%s3539_s0 + $0x1a8] sm:$0xff]  ;;  %v86_v55 = vld [vmem:[%s3539_s0 + $0x1b0] sm:$0xff]  ;;  %v87_v56 = vld [vmem:[%s3539_s0 + $0x1b8] sm:$0xff]  ;;  %vm1145_vm2 = vcmp.lt.s32.totalorder %v1134_v7, %v2852_v9  ;;  %vm1144_vm5 = vcmp.lt.s32.totalorder %v2847_v4, %v2852_v9 }
  0x14   :  { %1936 = vmatmul.mubr.msk.f32.gmra.mrb[8].mxu0 %vm104_vm0, %v41_v10  ;;  %v88_v57 = vld [vmem:[%s3539_s0 + $0x1c0] sm:$0xff]  ;;  %v89_v58 = vld [vmem:[%s3539_s0 + $0x1c8] sm:$0xff]  ;;  %v90_v59 = vld [vmem:[%s3539_s0 + $0x1d0] sm:$0xff] }
  0x15   :  { %1938 = vmatprep.mubr.msk.f32.mxu0 %vm104_vm0, %v42_v11  ;;  %v91_v60 = vld [vmem:[%s3539_s0 + $0x1d8] sm:$0xff]  ;;  %v92_v61 = vld [vmem:[%s3539_s0 + $0x1e0] sm:$0xff]  ;;  %v93_v62 = vld [vmem:[%s3539_s0 + $0x1e8] sm:$0xff] }
  0x16   :  { %v94_v63 = vld [vmem:[%s3539_s0 + $0x1f0] sm:$0xff]  ;;  %v95_v0 = vld [vmem:[%s3539_s0 + $0x1f8] sm:$0xff]  ;;  %v2845_v3 = vld [vmem:[%s3540_s2] ss:$0 sm:$0xff] }
  0x17   :  { %vm1149_vm3 = vmand %vm1139_vm1, %vm1145_vm2 }
  0x18   :  { %1939 = vmatmul.mubr.msk.f32.gmra.mrb[10].mxu0 %vm104_vm0, %v43_v12  ;;  %vm2869_vm6 = vmand %vm1138_vm4, %vm1144_vm5 }
  0x19   :  { %1941 = vmatprep.mubr.msk.f32.mxu0 %vm104_vm0, %v44_v13 }
  0x1c   :  { %1942 = vmatmul.mubr.msk.f32.gmra.mrb[12].mxu0 %vm104_vm0, %v45_v14 }
  0x1d   :  { %1944 = vmatprep.mubr.msk.f32.mxu0 %vm104_vm0, %v46_v15 }
  0x20   :  { %1945 = vmatmul.mubr.msk.f32.gmra.mrb[14].mxu0 %vm104_vm0, %v47_v16  ;;  %v2529_v16 = vmov 0.00390625  }
  0x21   :  { %1947 = vmatprep.mubr.msk.f32.mxu0 %vm104_vm0, %v48_v17  ;;  %1726 = vmatprep.mubr.msk.f32.mxu1 %vm1149_vm3, %v2529_v16 }
  0x24   :  { %1948 = vmatmul.mubr.msk.f32.gmra.mrb[16].mxu0 %vm104_vm0, %v49_v18 }
  0x25   :  { %1950 = vmatprep.mubr.msk.f32.mxu0 %vm104_vm0, %v50_v19 }
  0x28   :  { %1951 = vmatmul.mubr.msk.f32.gmra.mrb[18].mxu0 %vm104_vm0, %v51_v20 }
  0x29   :  { %1953 = vmatprep.mubr.msk.f32.mxu0 %vm104_vm0, %v52_v21 }
  0x2c   :  { %1954 = vmatmul.mubr.msk.f32.gmra.mrb[20].mxu0 %vm104_vm0, %v53_v22 }
  0x2d   :  { %1956 = vmatprep.mubr.msk.f32.mxu0 %vm104_vm0, %v54_v23 }
  0x30   :  { %1957 = vmatmul.mubr.msk.f32.gmra.mrb[22].mxu0 %vm104_vm0, %v55_v24 }
  0x31   :  { %1959 = vmatprep.mubr.msk.f32.mxu0 %vm104_vm0, %v56_v25 }
  0x34   :  { %1960 = vmatmul.mubr.msk.f32.gmra.mrb[24].mxu0 %vm104_vm0, %v57_v26 }
  0x35   :  { %1962 = vmatprep.mubr.msk.f32.mxu0 %vm104_vm0, %v58_v27 }
  0x38   :  { %1963 = vmatmul.mubr.msk.f32.gmra.mrb[26].mxu0 %vm104_vm0, %v59_v28 }
  0x39   :  { %1965 = vmatprep.mubr.msk.f32.mxu0 %vm104_vm0, %v60_v29 }
  0x3c   :  { %1966 = vmatmul.mubr.msk.f32.gmra.mrb[28].mxu0 %vm104_vm0, %v61_v30 }
  0x3d   :  { %1968 = vmatprep.mubr.msk.f32.mxu0 %vm104_vm0, %v62_v31 }
  0x40   :  { %1969 = vmatmul.mubr.msk.f32.gmra.mrb[30].mxu0 %vm104_vm0, %v63_v32 }
  0x41   :  { %1971 = vmatprep.mubr.msk.f32.mxu0 %vm104_vm0, %v64_v33 }
  0x44   :  { %1972 = vmatmul.mubr.msk.f32.gmra.mrb[32].mxu0 %vm104_vm0, %v65_v34 }
  0x45   :  { %1974 = vmatprep.mubr.msk.f32.mxu0 %vm104_vm0, %v66_v35 }
  0x48   :  { %1975 = vmatmul.mubr.msk.f32.gmra.mrb[34].mxu0 %vm104_vm0, %v67_v36 }
  0x49   :  { %1977 = vmatprep.mubr.msk.f32.mxu0 %vm104_vm0, %v68_v37 }
  0x4c   :  { %1978 = vmatmul.mubr.msk.f32.gmra.mrb[36].mxu0 %vm104_vm0, %v69_v38 }
  0x4d   :  { %1980 = vmatprep.mubr.msk.f32.mxu0 %vm104_vm0, %v70_v39 }
  0x50   :  { %1981 = vmatmul.mubr.msk.f32.gmra.mrb[38].mxu0 %vm104_vm0, %v71_v40 }
  0x51   :  { %1983 = vmatprep.mubr.msk.f32.mxu0 %vm104_vm0, %v72_v41 }
  0x54   :  { %1984 = vmatmul.mubr.msk.f32.gmra.mrb[40].mxu0 %vm104_vm0, %v73_v42 }
  0x55   :  { %1986 = vmatprep.mubr.msk.f32.mxu0 %vm104_vm0, %v74_v43 }
  0x58   :  { %1987 = vmatmul.mubr.msk.f32.gmra.mrb[42].mxu0 %vm104_vm0, %v75_v44 }
  0x59   :  { %1989 = vmatprep.mubr.msk.f32.mxu0 %vm104_vm0, %v76_v45 }
  0x5c   :  { %1990 = vmatmul.mubr.msk.f32.gmra.mrb[44].mxu0 %vm104_vm0, %v77_v46 }
  0x5d   :  { %1992 = vmatprep.mubr.msk.f32.mxu0 %vm104_vm0, %v78_v47 }
  0x60   :  { %1993 = vmatmul.mubr.msk.f32.gmra.mrb[46].mxu0 %vm104_vm0, %v79_v48 }
  0x61   :  { %1995 = vmatprep.mubr.msk.f32.mxu0 %vm104_vm0, %v80_v49 }
  0x64   :  { %1996 = vmatmul.mubr.msk.f32.gmra.mrb[48].mxu0 %vm104_vm0, %v81_v50 }
  0x65   :  { %1998 = vmatprep.mubr.msk.f32.mxu0 %vm104_vm0, %v82_v51 }
  0x68   :  { %1999 = vmatmul.mubr.msk.f32.gmra.mrb[50].mxu0 %vm104_vm0, %v83_v52 }
  0x69   :  { %2001 = vmatprep.mubr.msk.f32.mxu0 %vm104_vm0, %v84_v53 }
  0x6c   :  { %2002 = vmatmul.mubr.msk.f32.gmra.mrb[52].mxu0 %vm104_vm0, %v85_v54 }
  0x6d   :  { %2004 = vmatprep.mubr.msk.f32.mxu0 %vm104_vm0, %v86_v55 }
  0x70   :  { %2005 = vmatmul.mubr.msk.f32.gmra.mrb[54].mxu0 %vm104_vm0, %v87_v56 }
  0x71   :  { %2007 = vmatprep.mubr.msk.f32.mxu0 %vm104_vm0, %v88_v57 }
  0x74   :  { %2008 = vmatmul.mubr.msk.f32.gmra.mrb[56].mxu0 %vm104_vm0, %v89_v58 }
  0x75   :  { %2010 = vmatprep.mubr.msk.f32.mxu0 %vm104_vm0, %v90_v59 }
  0x78   :  { %2011 = vmatmul.mubr.msk.f32.gmra.mrb[58].mxu0 %vm104_vm0, %v91_v60 }
  0x79   :  { %2013 = vmatprep.mubr.msk.f32.mxu0 %vm104_vm0, %v92_v61 }
  0x7c   :  { %2014 = vmatmul.mubr.msk.f32.gmra.mrb[60].mxu0 %vm104_vm0, %v93_v62 }
  0x7d   :  { %2016 = vmatprep.mubr.msk.f32.mxu0 %vm104_vm0, %v94_v63 }
  0x80   :  { %2017 = vmatmul.mubr.msk.f32.gmra.mrb[62].mxu0 %vm104_vm0, %v95_v0 }
  0xd7   :  { %v1925_v6 = vpop.f32.mrb[0].mxu0 }
  0xd8   :  { %v2855_v10 = vadd.f32 %v1925_v6, %v2845_v3  ;;  %v363_v11 = vpop.f32.mrb[1].mxu0 }
  0xd9   :  { %v2858_v12 = vadd.f32 %v2845_v3, %v363_v11 }
  0xda   :  { %v1663_v13 = vmul.f32 -1.442695, %v2855_v10 }
  0xdb   :  { %v1662_v14 = vmul.f32 -1.442695, %v2858_v12  ;;  %v1928_v15 = vpop.f32.mrb[2].mxu0 }
  0xdc   :  { %2264 = vpow2.f32 %v1663_v13  ;;  %v2874_v18 = vadd.f32 %v1928_v15, %v2845_v3  ;;  %v373_v19 = vpop.f32.mrb[3].mxu0 }
  0xdd   :  { %2266 = vpow2.f32 %v1662_v14  ;;  %v2877_v20 = vadd.f32 %v2845_v3, %v373_v19 }
  0xde   :  { %v1665_v21 = vmul.f32 -1.442695, %v2874_v18 }
  0xdf   :  { %v1664_v22 = vmul.f32 -1.442695, %v2877_v20  ;;  %v1931_v23 = vpop.f32.mrb[4].mxu0 }
  0xe0   :  { %2268 = vpow2.f32 %v1665_v21  ;;  %v2882_v24 = vadd.f32 %v1931_v23, %v2845_v3  ;;  %v383_v25 = vpop.f32.mrb[5].mxu0 }
  0xe1   :  { %2270 = vpow2.f32 %v1664_v22  ;;  %v2885_v26 = vadd.f32 %v2845_v3, %v383_v25 }
  0xe2   :  { %v1667_v27 = vmul.f32 -1.442695, %v2882_v24 }
  0xe3   :  { %v1666_v28 = vmul.f32 -1.442695, %v2885_v26  ;;  %v1934_v29 = vpop.f32.mrb[6].mxu0 }
  0xe4   :  { %2272 = vpow2.f32 %v1667_v27  ;;  %v2890_v30 = vadd.f32 %v1934_v29, %v2845_v3  ;;  %v393_v31 = vpop.f32.mrb[7].mxu0 }
  0xe5   :  { %2274 = vpow2.f32 %v1666_v28  ;;  %v2893_v32 = vadd.f32 %v2845_v3, %v393_v31 }
  0xe6   :  { %v2265_v33 = vpop.eup %2264  ;;  %v1669_v34 = vmul.f32 -1.442695, %v2890_v30 }
  0xe7   :  { %v2267_v35 = vpop.eup %2266  ;;  %v875_v36 = vadd.f32 1.0, %v2265_v33  ;;  %v1668_v37 = vmul.f32 -1.442695, %v2893_v32  ;;  %v1937_v38 = vpop.f32.mrb[8].mxu0 }
  0xe8   :  { %v874_v39 = vadd.f32 1.0, %v2267_v35  ;;  %2276 = vpow2.f32 %v1669_v34  ;;  %v2898_v40 = vadd.f32 %v1937_v38, %v2845_v3  ;;  %v403_v41 = vpop.f32.mrb[9].mxu0 }
  0xe9   :  { %2278 = vrcp.f32 %v875_v36  ;;  %v2901_v42 = vadd.f32 %v2845_v3, %v403_v41 }
  0xea   :  { %v2269_v43 = vpop.eup %2268  ;;  %2280 = vrcp.f32 %v874_v39  ;;  %v1671_v44 = vmul.f32 -1.442695, %v2898_v40 }
  0xeb   :  { %v2271_v45 = vpop.eup %2270  ;;  %v877_v46 = vadd.f32 1.0, %v2269_v43  ;;  %2282 = vpow2.f32 %v1668_v37  ;;  %v1670_v47 = vmul.f32 -1.442695, %v2901_v42  ;;  %v1940_v48 = vpop.f32.mrb[10].mxu0  ;;  %v1135_v37 = vadd.s32 256, %v2847_v4 }
  0xec   :  { %v876_v49 = vadd.f32 1.0, %v2271_v45  ;;  %2284 = vpow2.f32 %v1671_v44  ;;  %v2906_v50 = vadd.f32 %v1940_v48, %v2845_v3  ;;  %v413_v51 = vpop.f32.mrb[11].mxu0 }
  0xed   :  { %2286 = vrcp.f32 %v877_v46  ;;  %v2909_v52 = vadd.f32 %v2845_v3, %v413_v51  ;;  %vm1140_vm10 = vcmp.ge.s32.totalorder %v1135_v37, %v2850_v8  ;;  %vm1146_vm11 = vcmp.lt.s32.totalorder %v1135_v37, %v2852_v9 }
  0xee   :  { %v2273_v53 = vpop.eup %2272  ;;  %2288 = vrcp.f32 %v876_v49  ;;  %v1673_v54 = vmul.f32 -1.442695, %v2906_v50  ;;  %vm2976_vm12 = vmand %vm1140_vm10, %vm1146_vm11 }
  0xef   :  { %v2275_v55 = vpop.eup %2274  ;;  %v879_v56 = vadd.f32 1.0, %v2273_v53  ;;  %2290 = vpow2.f32 %v1670_v47  ;;  %v1672_v57 = vmul.f32 -1.442695, %v2909_v52  ;;  %v1943_v58 = vpop.f32.mrb[12].mxu0 }
  0xf0   :  { %v878_v59 = vadd.f32 1.0, %v2275_v55  ;;  %2292 = vpow2.f32 %v1673_v54  ;;  %v2914_v60 = vadd.f32 %v1943_v58, %v2845_v3  ;;  %v423_v61 = vpop.f32.mrb[13].mxu0 }
  0xf1   :  { %2294 = vrcp.f32 %v879_v56  ;;  %v2917_v62 = vadd.f32 %v2845_v3, %v423_v61 }
  0xf2   :  { %v2277_v63 = vpop.eup %2276  ;;  %2296 = vrcp.f32 %v878_v59  ;;  %v1675_v0 = vmul.f32 -1.442695, %v2914_v60 }
  0xf3   :  { %v2279_v1 = vpop.eup %2278  ;;  %v881_v2 = vadd.f32 1.0, %v2277_v63  ;;  %2298 = vpow2.f32 %v1672_v57  ;;  %v1674_v5 = vmul.f32 -1.442695, %v2917_v62  ;;  %v1946_v6 = vpop.f32.mrb[14].mxu0 }
  0xf4   :  { %v2281_v7 = vpop.eup %2280  ;;  %v2922_v11 = vmul.f32 %v2279_v1, %v2855_v10  ;;  %2300 = vpow2.f32 %v1675_v0  ;;  %v2925_v13 = vadd.f32 %v1946_v6, %v2845_v3  ;;  %v433_v14 = vpop.f32.mrb[15].mxu0 }
  0xf5   :  { %v2283_v15 = vpop.eup %2282  ;;  %v2928_v19 = vmul.f32 %v2281_v7, %v2858_v12  ;;  %2302 = vrcp.f32 %v881_v2  ;;  %v2931_v21 = vadd.f32 %v2845_v3, %v433_v14  ;;  %v1136_v12 = vadd.s32 384, %v2847_v4 }
  0xf6   :  { %v2285_v22 = vpop.eup %2284  ;;  %v880_v23 = vadd.f32 1.0, %v2283_v15  ;;  %2304 = vpow2.f32 %v1674_v5  ;;  %v1677_v25 = vmul.f32 -1.442695, %v2925_v13 }
  0xf7   :  { %v2287_v10 = vpop.eup %2286  ;;  %v883_v27 = vadd.f32 1.0, %v2285_v22  ;;  %v1676_v28 = vmul.f32 -1.442695, %v2931_v21  ;;  %v1949_v29 = vpop.f32.mrb[16].mxu0  ;;  %v2126_v31 = vpack.c.bf16 %v2922_v11, %v2928_v19  ;;  %vm1141_vm7 = vcmp.ge.s32.totalorder %v1136_v12, %v2850_v8 }
  0xf8   :  { %v2289_v33 = vpop.eup %2288  ;;  %v2939_v34 = vmul.f32 %v2287_v10, %v2874_v18  ;;  %2306 = vrcp.f32 %v880_v23  ;;  %v2942_v35 = vadd.f32 %v1949_v29, %v2845_v3  ;;  %v443_v36 = vpop.f32.mrb[17].mxu0  ;;  %vm1147_vm8 = vcmp.lt.s32.totalorder %v1136_v12, %v2852_v9 }
  0xf9   :  { %v2291_v38 = vpop.eup %2290  ;;  %v2946_v39 = vmul.f32 %v2289_v33, %v2877_v20  ;;  %2308 = vrcp.f32 %v883_v27  ;;  %v2949_v41 = vadd.f32 %v2845_v3, %v443_v36  ;;  %vm2957_vm9 = vmand %vm1141_vm7, %vm1147_vm8 }
  0xfa   :  { %v2293_v43 = vpop.eup %2292  ;;  %v882_v18 = vadd.f32 1.0, %v2291_v38  ;;  %2310 = vpow2.f32 %v1677_v25  ;;  %v1679_v44 = vmul.f32 -1.442695, %v2942_v35 }
  0xfb   :  { %v2295_v45 = vpop.eup %2294  ;;  %v885_v46 = vadd.f32 1.0, %v2293_v43  ;;  %2312 = vpow2.f32 %v1676_v28  ;;  %v1678_v47 = vmul.f32 -1.442695, %v2949_v41  ;;  %v1952_v20 = vpop.f32.mrb[18].mxu0  ;;  %v2130_v48 = vpack.c.bf16 %v2939_v34, %v2946_v39 }
  0xfc   :  { %v2297_v51 = vpop.eup %2296  ;;  %v2962_v53 = vmul.f32 %v2295_v45, %v2882_v24  ;;  %2314 = vrcp.f32 %v882_v18  ;;  %v2965_v54 = vadd.f32 %v1952_v20, %v2845_v3  ;;  %v453_v55 = vpop.f32.mrb[19].mxu0 }
  0xfd   :  { %v2299_v56 = vpop.eup %2298  ;;  %v2969_v57 = vmul.f32 %v2297_v51, %v2885_v26  ;;  %2316 = vrcp.f32 %v885_v46  ;;  %v2972_v58 = vadd.f32 %v2845_v3, %v453_v55 }
  0xfe   :  { %v2301_v59 = vpop.eup %2300  ;;  %v884_v24 = vadd.f32 1.0, %v2299_v56  ;;  %2318 = vpow2.f32 %v1679_v44  ;;  %v1681_v61 = vmul.f32 -1.442695, %v2965_v54 }
  0xff   :  { %v2303_v8 = vpop.eup %2302  ;;  %v887_v0 = vadd.f32 1.0, %v2301_v59  ;;  %2320 = vpow2.f32 %v1678_v47  ;;  %v1955_v26 = vpop.f32.mrb[20].mxu0  ;;  %v2134_v1 = vpack.c.bf16 %v2962_v53, %v2969_v57  ;;  %v1680_v9 = vmul.f32 -1.442695, %v2972_v58 }
 0x100   :  { %v2305_v2 = vpop.eup %2304  ;;  %2322 = vrcp.f32 %v884_v24  ;;  %v2984_v5 = vadd.f32 %v1955_v26, %v2845_v3  ;;  %v463_v6 = vpop.f32.mrb[21].mxu0  ;;  %v2987_v7 = vmul.f32 %v2303_v8, %v2890_v30 }
 0x101   :  { %2324 = vrcp.f32 %v887_v0  ;;  %v886_v14 = vadd.f32 1.0, %v2305_v2  ;;  %v2990_v15 = vadd.f32 %v2845_v3, %v463_v6 }
 0x102   :  { %v2307_v22 = vpop.eup %2306  ;;  %2326 = vpow2.f32 %v1681_v61  ;;  %v1683_v23 = vmul.f32 -1.442695, %v2984_v5 }
 0x103   :  { %v2309_v25 = vpop.eup %2308  ;;  %v2994_v10 = vmul.f32 %v2307_v22, %v2893_v32  ;;  %2328 = vrcp.f32 %v886_v14  ;;  %v1682_v27 = vmul.f32 -1.442695, %v2990_v15  ;;  %v1958_v28 = vpop.f32.mrb[22].mxu0 }
 0x104   :  { %v2311_v29 = vpop.eup %2310  ;;  %v2998_v30 = vmul.f32 %v2309_v25, %v2898_v40  ;;  %2330 = vpow2.f32 %v1680_v9  ;;  %v3001_v12 = vadd.f32 %v1958_v28, %v2845_v3  ;;  %v473_v33 = vpop.f32.mrb[23].mxu0 }
 0x105   :  { %v2313_v36 = vpop.eup %2312  ;;  %v889_v37 = vadd.f32 1.0, %v2311_v29  ;;  %2332 = vpow2.f32 %v1683_v23  ;;  %v3004_v38 = vadd.f32 %v2845_v3, %v473_v33  ;;  %v2138_v32 = vpack.c.bf16 %v2987_v7, %v2994_v10 }
 0x106   :  { %v2315_v43 = vpop.eup %2314  ;;  %v888_v18 = vadd.f32 1.0, %v2313_v36  ;;  %2334 = vpow2.f32 %v1682_v27  ;;  %v1685_v40 = vmul.f32 -1.442695, %v3001_v12 }
 0x107   :  { %v2317_v44 = vpop.eup %2316  ;;  %v3010_v45 = vmul.f32 %v2315_v43, %v2901_v42  ;;  %2336 = vrcp.f32 %v889_v37  ;;  %v1684_v46 = vmul.f32 -1.442695, %v3004_v38  ;;  %v1961_v47 = vpop.f32.mrb[24].mxu0 }
 0x108   :  { %v2319_v20 = vpop.eup %2318  ;;  %v3014_v51 = vmul.f32 %v2317_v44, %v2906_v50  ;;  %2338 = vrcp.f32 %v888_v18  ;;  %v3017_v55 = vadd.f32 %v1961_v47, %v2845_v3  ;;  %v483_v56 = vpop.f32.mrb[25].mxu0 }
 0x109   :  { %v2321_v59 = vpop.eup %2320  ;;  %v891_v24 = vadd.f32 1.0, %v2319_v20  ;;  %2340 = vpow2.f32 %v1685_v40  ;;  %v3020_v61 = vadd.f32 %v2845_v3, %v483_v56  ;;  %v2142_v42 = vpack.c.bf16 %v2998_v30, %v3010_v45 }
 0x10a   :  { %v2323_v8 = vpop.eup %2322  ;;  %v890_v0 = vadd.f32 1.0, %v2321_v59  ;;  %2342 = vpow2.f32 %v1684_v46  ;;  %v1687_v50 = vmul.f32 -1.442695, %v3017_v55 }
 0x10b   :  { %v2325_v26 = vpop.eup %2324  ;;  %v3026_v2 = vmul.f32 %v2323_v8, %v2909_v52  ;;  %2344 = vrcp.f32 %v891_v24  ;;  %v1686_v9 = vmul.f32 -1.442695, %v3020_v61  ;;  %v1964_v6 = vpop.f32.mrb[26].mxu0 }
 0x10c   :  { %v2327_v14 = vpop.eup %2326  ;;  %v3030_v22 = vmul.f32 %v2325_v26, %v2914_v60  ;;  %2346 = vrcp.f32 %v890_v0  ;;  %v3033_v23 = vadd.f32 %v1964_v6, %v2845_v3  ;;  %v493_v25 = vpop.f32.mrb[27].mxu0 }
 0x10d   :  { %v2329_v27 = vpop.eup %2328  ;;  %v893_v28 = vadd.f32 1.0, %v2327_v14  ;;  %2348 = vpow2.f32 %v1687_v50  ;;  %v3036_v29 = vadd.f32 %v2845_v3, %v493_v25  ;;  %v2146_v52 = vpack.c.bf16 %v3014_v51, %v3026_v2 }
 0x10e   :  { %v2331_v33 = vpop.eup %2330  ;;  %v3041_v36 = vmul.f32 %v2329_v27, %v2917_v62  ;;  %2350 = vpow2.f32 %v1686_v9  ;;  %v1689_v60 = vmul.f32 -1.442695, %v3033_v23 }
 0x10f   :  { %v2333_v37 = vpop.eup %2332  ;;  %2352 = vrcp.f32 %v893_v28  ;;  %v892_v43 = vadd.f32 1.0, %v2331_v33  ;;  %v1688_v18 = vmul.f32 -1.442695, %v3036_v29  ;;  %v1967_v40 = vpop.f32.mrb[28].mxu0 }
 0x110   :  { %v2335_v44 = vpop.eup %2334  ;;  %v895_v46 = vadd.f32 1.0, %v2333_v37  ;;  %2354 = vpow2.f32 %v1689_v60  ;;  %v3046_v47 = vadd.f32 %v1967_v40, %v2845_v3  ;;  %v503_v20 = vpop.f32.mrb[29].mxu0  ;;  %v2150_v62 = vpack.c.bf16 %v3030_v22, %v3041_v36 }
 0x111   :  { %v2337_v56 = vpop.eup %2336  ;;  %2356 = vrcp.f32 %v892_v43  ;;  %v894_v59 = vadd.f32 1.0, %v2335_v44  ;;  %v3051_v24 = vadd.f32 %v2845_v3, %v503_v20 }
 0x112   :  { %v2339_v8 = vpop.eup %2338  ;;  %v3054_v0 = vmul.f32 %v2337_v56, %v2925_v13  ;;  %2358 = vrcp.f32 %v895_v46  ;;  %v1691_v50 = vmul.f32 -1.442695, %v3046_v47 }
 0x113   :  { %v2341_v26 = vpop.eup %2340  ;;  %v3058_v9 = vmul.f32 %v2339_v8, %v2931_v21  ;;  %2360 = vrcp.f32 %v894_v59  ;;  %v1970_v6 = vpop.f32.mrb[30].mxu0  ;;  %v1690_v27 = vmul.f32 -1.442695, %v3051_v24 }
 0x114   :  { %v2343_v14 = vpop.eup %2342  ;;  %v897_v25 = vadd.f32 1.0, %v2341_v26  ;;  %2362 = vpow2.f32 %v1688_v18  ;;  %v3062_v28 = vadd.f32 %v1970_v6, %v2845_v3  ;;  %v513_v33 = vpop.f32.mrb[31].mxu0 }
 0x115   :  { %v2345_v13 = vpop.eup %2344  ;;  %v896_v60 = vadd.f32 1.0, %v2343_v14  ;;  %2364 = vpow2.f32 %v1691_v50  ;;  %v3065_v37 = vadd.f32 %v2845_v3, %v513_v33  ;;  %v2154_v21 = vpack.c.bf16 %v3054_v0, %v3058_v9 }
 0x116   :  { %v2347_v43 = vpop.eup %2346  ;;  %2366 = vrcp.f32 %v897_v25  ;;  %v1693_v40 = vmul.f32 -1.442695, %v3062_v28  ;;  %v1083_v18 = vmul.f32 %v2345_v13, %v2942_v35 }
 0x117   :  { %v2349_v44 = vpop.eup %2348  ;;  %2368 = vrcp.f32 %v896_v60  ;;  %v1973_v46 = vpop.f32.mrb[32].mxu0  ;;  %v1082_v20 = vmul.f32 %v2347_v43, %v2949_v41  ;;  %v1692_v8 = vmul.f32 -1.442695, %v3065_v37 }
 0x118   :  { %v2351_v56 = vpop.eup %2350  ;;  %v899_v59 = vadd.f32 1.0, %v2349_v44  ;;  %2370 = vpow2.f32 %v1690_v27  ;;  %v3074_v50 = vadd.f32 %v1973_v46, %v2845_v3  ;;  %v523_v26 = vpop.f32.mrb[33].mxu0 }
 0x119   :  { %v2353_v6 = vpop.eup %2352  ;;  %v898_v14 = vadd.f32 1.0, %v2351_v56  ;;  %2372 = vpow2.f32 %v1693_v40  ;;  %v3077_v25 = vadd.f32 %v2845_v3, %v523_v26  ;;  %v2124_v35 = vpack.c.bf16 %v1083_v18, %v1082_v20 }
 0x11a   :  { %v2355_v33 = vpop.eup %2354  ;;  %v1085_v13 = vmul.f32 %v2353_v6, %v2965_v54  ;;  %2374 = vrcp.f32 %v899_v59  ;;  %v1695_v41 = vmul.f32 -1.442695, %v3074_v50 }
 0x11b   :  { %v2357_v27 = vpop.eup %2356  ;;  %2376 = vrcp.f32 %v898_v14  ;;  %v901_v60 = vadd.f32 1.0, %v2355_v33  ;;  %v1694_v43 = vmul.f32 -1.442695, %v3077_v25  ;;  %2125 = vmatprep.subr.bf16.mxu1 %v2124_v35  ;;  %v1976_v44 = vpop.f32.mrb[34].mxu0 }
 0x11c   :  { %v2359_v46 = vpop.eup %2358  ;;  %v1084_v40 = vmul.f32 %v2357_v27, %v2972_v58  ;;  %2378 = vpow2.f32 %v1692_v8  ;;  %2127 = vmatpush3.bf16.msra.mxu1 %v2126_v31  ;;  %v3087_v54 = vadd.f32 %v1976_v44, %v2845_v3  ;;  %v533_v18 = vpop.f32.mrb[35].mxu0 }
 0x11d   :  { %v2361_v20 = vpop.eup %2360  ;;  %v1087_v56 = vmul.f32 %v2359_v46, %v2984_v5  ;;  %2380 = vrcp.f32 %v901_v60  ;;  %v3091_v59 = vadd.f32 %v2845_v3, %v533_v18 }
 0x11e   :  { %v2363_v26 = vpop.eup %2362  ;;  %v1086_v6 = vmul.f32 %v2361_v20, %v2990_v15  ;;  %2382 = vpow2.f32 %v1695_v41  ;;  %v1697_v58 = vmul.f32 -1.442695, %v3087_v54  ;;  %v2128_v8 = vpack.c.bf16 %v1085_v13, %v1084_v40 }
 0x11f   :  { %v2365_v11 = vpop.eup %2364  ;;  %v900_v19 = vadd.f32 1.0, %v2363_v26  ;;  %2384 = vpow2.f32 %v1694_v43  ;;  %v1696_v31 = vmul.f32 -1.442695, %v3091_v59  ;;  %v1979_v14 = vpop.f32.mrb[36].mxu0 }
 0x120   :  { %v2367_v35 = vpop.eup %2366  ;;  %v903_v33 = vadd.f32 1.0, %v2365_v11  ;;  %2386 = vpow2.f32 %v1697_v58  ;;  %2129 = vmatprep.subr.bf16.mxu1 %v2128_v8  ;;  %v3097_v5 = vadd.f32 %v1979_v14, %v2845_v3  ;;  %v543_v27 = vpop.f32.mrb[37].mxu0  ;;  %v2132_v60 = vpack.c.bf16 %v1087_v56, %v1086_v6 }
 0x121   :  { %v2369_v15 = vpop.eup %2368  ;;  %v1089_v41 = vmul.f32 %v2367_v35, %v3001_v12  ;;  %2388 = vrcp.f32 %v900_v19  ;;  %2131 = vmatpush3.bf16.msra.mxu1 %v2130_v48  ;;  %v3104_v13 = vadd.f32 %v2845_v3, %v543_v27 }
 0x122   :  { %v2371_v43 = vpop.eup %2370  ;;  %v1088_v44 = vmul.f32 %v2369_v15, %v3004_v38  ;;  %2390 = vrcp.f32 %v903_v33  ;;  %v1699_v46 = vmul.f32 -1.442695, %v3097_v5  ;;  %2133 = vmatprep.subr.bf16.mxu1 %v2132_v60 }
 0x123   :  { %v2373_v40 = vpop.eup %2372  ;;  %v902_v18 = vadd.f32 1.0, %v2371_v43  ;;  %2392 = vpow2.f32 %v1696_v31  ;;  %v1698_v12 = vmul.f32 -1.442695, %v3104_v13  ;;  %v1982_v20 = vpop.f32.mrb[38].mxu0 }
 0x124   :  { %v2375_v56 = vpop.eup %2374  ;;  %v905_v26 = vadd.f32 1.0, %v2373_v40  ;;  %2394 = vpow2.f32 %v1699_v46  ;;  %v3110_v34 = vadd.f32 %v1982_v20, %v2845_v3  ;;  %v553_v39 = vpop.f32.mrb[39].mxu0  ;;  %v2136_v48 = vpack.c.bf16 %v1089_v41, %v1088_v44 }
 0x125   :  { %v2377_v6 = vpop.eup %2376  ;;  %v1091_v38 = vmul.f32 %v2375_v56, %v3017_v55  ;;  %2396 = vrcp.f32 %v902_v18  ;;  %2135 = vmatpush3.bf16.msra.mxu1 %v2134_v1  ;;  %v3117_v58 = vadd.f32 %v2845_v3, %v553_v39 }
 0x126   :  { %v2379_v8 = vpop.eup %2378  ;;  %v1090_v11 = vmul.f32 %v2377_v6, %v3020_v61  ;;  %2398 = vrcp.f32 %v905_v26  ;;  %v1701_v19 = vmul.f32 -1.442695, %v3110_v34  ;;  %2137 = vmatprep.subr.bf16.mxu1 %v2136_v48 }
 0x127   :  { %v2381_v31 = vpop.eup %2380  ;;  %v904_v14 = vadd.f32 1.0, %v2379_v8  ;;  %2400 = vpow2.f32 %v1698_v12  ;;  %v1700_v55 = vmul.f32 -1.442695, %v3117_v58  ;;  %v1985_v35 = vpop.f32.mrb[40].mxu0 }
 0x128   :  { %v2383_v33 = vpop.eup %2382  ;;  %2402 = vpow2.f32 %v1701_v19  ;;  %v3123_v53 = vadd.f32 %v1985_v35, %v2845_v3  ;;  %v563_v57 = vpop.f32.mrb[41].mxu0  ;;  %v2140_v1 = vpack.c.bf16 %v1091_v38, %v1090_v11  ;;  %v1093_v41 = vmul.f32 %v2381_v31, %v3033_v23 }
 0x129   :  { %v2385_v27 = vpop.eup %2384  ;;  %2404 = vrcp.f32 %v904_v14  ;;  %v907_v61 = vadd.f32 1.0, %v2383_v33  ;;  %2139 = vmatpush3.bf16.msra.mxu1 %v2138_v32  ;;  %v3129_v60 = vadd.f32 %v2845_v3, %v563_v57 }
 0x12a   :  { %v2387_v15 = vpop.eup %2386  ;;  %v906_v43 = vadd.f32 1.0, %v2385_v27  ;;  %2406 = vpow2.f32 %v1700_v55  ;;  %v1703_v44 = vmul.f32 -1.442695, %v3123_v53  ;;  %2141 = vmatprep.subr.bf16.mxu1 %v2140_v1 }
 0x12b   :  { %v2389_v46 = vpop.eup %2388  ;;  %2408 = vrcp.f32 %v907_v61  ;;  %v909_v40 = vadd.f32 1.0, %v2387_v15  ;;  %v1702_v18 = vmul.f32 -1.442695, %v3129_v60  ;;  %v1988_v12 = vpop.f32.mrb[42].mxu0 }
 0x12c   :  { %v2391_v20 = vpop.eup %2390  ;;  %v1092_v7 = vmul.f32 %v2389_v46, %v3036_v29  ;;  %2410 = vrcp.f32 %v906_v43  ;;  %v3136_v10 = vadd.f32 %v1988_v12, %v2845_v3  ;;  %v573_v32 = vpop.f32.mrb[43].mxu0 }
 0x12d   :  { %v2393_v23 = vpop.eup %2392  ;;  %v1095_v56 = vmul.f32 %v2391_v20, %v3046_v47  ;;  %2412 = vrcp.f32 %v909_v40  ;;  %2143 = vmatpush3.bf16.msra.mxu1 %v2142_v42  ;;  %v3143_v26 = vadd.f32 %v2845_v3, %v573_v32 }
 0x12e   :  { %v2395_v39 = vpop.eup %2394  ;;  %v908_v48 = vadd.f32 1.0, %v2393_v23  ;;  %2414 = vpow2.f32 %v1703_v44  ;;  %v1705_v29 = vmul.f32 -1.442695, %v3136_v10  ;;  %v2144_v6 = vpack.c.bf16 %v1093_v41, %v1092_v7 }
 0x12f   :  { %v2397_v38 = vpop.eup %2396  ;;  %v911_v8 = vadd.f32 1.0, %v2395_v39  ;;  %2416 = vpow2.f32 %v1702_v18  ;;  %v1704_v11 = vmul.f32 -1.442695, %v3143_v26  ;;  %v1991_v47 = vpop.f32.mrb[44].mxu0 }
 0x130   :  { %v2399_v19 = vpop.eup %2398  ;;  %v1094_v31 = vmul.f32 %v2397_v38, %v3051_v24  ;;  %2418 = vrcp.f32 %v908_v48  ;;  %2145 = vmatprep.subr.bf16.mxu1 %v2144_v6  ;;  %v3149_v30 = vadd.f32 %v1991_v47, %v2845_v3  ;;  %v583_v45 = vpop.f32.mrb[45].mxu0 }
 0x131   :  { %v2401_v42 = vpop.eup %2400  ;;  %v1097_v14 = vmul.f32 %v2399_v19, %v3062_v28  ;;  %2420 = vrcp.f32 %v911_v8  ;;  %2147 = vmatpush3.bf16.msra.mxu1 %v2146_v52  ;;  %v3156_v55 = vadd.f32 %v2845_v3, %v583_v45 }
 0x132   :  { %v2403_v35 = vpop.eup %2402  ;;  %v910_v33 = vadd.f32 1.0, %v2401_v42  ;;  %2422 = vpow2.f32 %v1705_v29  ;;  %v1707_v24 = vmul.f32 -1.442695, %v3149_v30  ;;  %v2148_v57 = vpack.c.bf16 %v1095_v56, %v1094_v31 }
 0x133   :  { %v2405_v1 = vpop.eup %2404  ;;  %v913_v27 = vadd.f32 1.0, %v2403_v35  ;;  %2424 = vpow2.f32 %v1704_v11  ;;  %v1994_v61 = vpop.f32.mrb[46].mxu0  ;;  %v1706_v51 = vmul.f32 -1.442695, %v3156_v55 }
 0x134   :  { %v2407_v15 = vpop.eup %2406  ;;  %v1096_v28 = vmul.f32 %v2405_v1, %v3065_v37  ;;  %2426 = vrcp.f32 %v910_v33  ;;  %2149 = vmatprep.subr.bf16.mxu1 %v2148_v57  ;;  %v3162_v2 = vadd.f32 %v1994_v61, %v2845_v3  ;;  %v593_v52 = vpop.f32.mrb[47].mxu0 }
 0x135   :  { %v2409_v41 = vpop.eup %2408  ;;  %2428 = vrcp.f32 %v913_v27  ;;  %v912_v43 = vadd.f32 1.0, %v2407_v15  ;;  %2151 = vmatpush3.bf16.msra.mxu1 %v2150_v62  ;;  %v3168_v44 = vadd.f32 %v2845_v3, %v593_v52 }
 0x136   :  { %v2411_v46 = vpop.eup %2410  ;;  %v3171_v37 = vmul.f32 %v2409_v41, %v3074_v50  ;;  %2430 = vpow2.f32 %v1707_v24  ;;  %v1709_v40 = vmul.f32 -1.442695, %v3162_v2  ;;  %v2152_v18 = vpack.c.bf16 %v1097_v14, %v1096_v28 }
 0x137   :  { %v2413_v12 = vpop.eup %2412  ;;  %v3175_v20 = vmul.f32 %v2411_v46, %v3077_v25  ;;  %2432 = vrcp.f32 %v912_v43  ;;  %v1708_v7 = vmul.f32 -1.442695, %v3168_v44  ;;  %v1997_v22 = vpop.f32.mrb[48].mxu0 }
 0x138   :  { %v2415_v36 = vpop.eup %2414  ;;  %v3179_v62 = vmul.f32 %v2413_v12, %v3087_v54  ;;  %2434 = vpow2.f32 %v1706_v51  ;;  %2153 = vmatprep.subr.bf16.mxu1 %v2152_v18  ;;  %v3182_v50 = vadd.f32 %v1997_v22, %v2845_v3  ;;  %v603_v32 = vpop.f32.mrb[49].mxu0 }
 0x139   :  { %v2417_v23 = vpop.eup %2416  ;;  %v2158_v56 = vpack.c.bf16 %v3171_v37, %v3175_v20  ;;  %v915_v25 = vadd.f32 1.0, %v2415_v36  ;;  %2436 = vpow2.f32 %v1709_v40  ;;  %2155 = vmatpush3.bf16.msra.mxu1 %v2154_v21  ;;  %v3190_v39 = vadd.f32 %v2845_v3, %v603_v32 }
 0x13a   :  { %v2419_v54 = vpop.eup %2418  ;;  %v914_v48 = vadd.f32 1.0, %v2417_v23  ;;  %2438 = vpow2.f32 %v1708_v7  ;;  %v1711_v29 = vmul.f32 -1.442695, %v3182_v50 }
 0x13b   :  { %v2421_v6 = vpop.eup %2420  ;;  %v3194_v38 = vmul.f32 %v2419_v54, %v3091_v59  ;;  %2440 = vrcp.f32 %v915_v25  ;;  %v1710_v8 = vmul.f32 -1.442695, %v3190_v39  ;;  %v2000_v11 = vpop.f32.mrb[50].mxu0 }
 0x13c   :  { %v2423_v47 = vpop.eup %2422  ;;  %v3198_v0 = vmul.f32 %v2421_v6, %v3097_v5  ;;  %2442 = vrcp.f32 %v914_v48  ;;  %v3201_v9 = vadd.f32 %v2000_v11, %v2845_v3  ;;  %v613_v21 = vpop.f32.mrb[51].mxu0  ;;  %1727 = vmatmul.mubr.msk.f32.vlgmr.msra.gmra.mrb[0].mxu1 %vm2869_vm6, %v2529_v16 }
 0x13d   :  { %v2425_v19 = vpop.eup %2424  ;;  %v2162_v59 = vpack.c.bf16 %v3179_v62, %v3194_v38  ;;  %v917_v31 = vadd.f32 1.0, %v2423_v47  ;;  %2444 = vpow2.f32 %v1711_v29  ;;  %v3209_v45 = vadd.f32 %v2845_v3, %v613_v21  ;;  %1728 = vmatprep.mubr.msk.f32.mxu1 %vm2957_vm9, %v2529_v16 }
 0x13e   :  { %v2427_v5 = vpop.eup %2426  ;;  %v916_v42 = vadd.f32 1.0, %v2425_v19  ;;  %2446 = vpow2.f32 %v1710_v8  ;;  %v1713_v14 = vmul.f32 -1.442695, %v3201_v9 }
 0x13f   :  { %v2429_v17 = vpop.eup %2428  ;;  %v3216_v35 = vmul.f32 %v2427_v5, %v3104_v13  ;;  %2448 = vrcp.f32 %v917_v31  ;;  %v1712_v33 = vmul.f32 -1.442695, %v3209_v45  ;;  %v2003_v24 = vpop.f32.mrb[52].mxu0 }
 0x140   :  { %v2431_v57 = vpop.eup %2430  ;;  %v3220_v1 = vmul.f32 %v2429_v17, %v3110_v34  ;;  %2450 = vrcp.f32 %v916_v42  ;;  %v3223_v49 = vadd.f32 %v2003_v24, %v2845_v3  ;;  %v623_v27 = vpop.f32.mrb[53].mxu0 }
 0x141   :  { %v2433_v61 = vpop.eup %2432  ;;  %v2166_v15 = vpack.c.bf16 %v3198_v0, %v3216_v35  ;;  %v919_v28 = vadd.f32 1.0, %v2431_v57  ;;  %2452 = vpow2.f32 %v1713_v14  ;;  %v3228_v13 = vadd.f32 %v2845_v3, %v623_v27 }
 0x142   :  { %v2435_v51 = vpop.eup %2434  ;;  %v3231_v52 = vmul.f32 %v2433_v61, %v3117_v58  ;;  %2454 = vpow2.f32 %v1712_v33  ;;  %v1715_v34 = vmul.f32 -1.442695, %v3223_v49 }
 0x143   :  { %v2437_v41 = vpop.eup %2436  ;;  %2456 = vrcp.f32 %v919_v28  ;;  %v918_v43 = vadd.f32 1.0, %v2435_v51  ;;  %v1714_v46 = vmul.f32 -1.442695, %v3228_v13  ;;  %v2006_v40 = vpop.f32.mrb[54].mxu0 }
 0x144   :  { %v2439_v18 = vpop.eup %2438  ;;  %v2170_v12 = vpack.c.bf16 %v3220_v1, %v3231_v52  ;;  %v921_v7 = vadd.f32 1.0, %v2437_v41  ;;  %2458 = vpow2.f32 %v1715_v34  ;;  %v3238_v22 = vadd.f32 %v2006_v40, %v2845_v3  ;;  %v633_v58 = vpop.f32.mrb[55].mxu0 }
 0x145   :  { %v2441_v36 = vpop.eup %2440  ;;  %2460 = vrcp.f32 %v918_v43  ;;  %v920_v32 = vadd.f32 1.0, %v2439_v18  ;;  %v3241_v23 = vadd.f32 %v2845_v3, %v633_v58  ;;  %v3254_v3 = vld [vmem:[%s3540_s2] ss:$0 sm:$0xff] }
 0x146   :  { %v2443_v25 = vpop.eup %2442  ;;  %v3244_v54 = vmul.f32 %v2441_v36, %v3123_v53  ;;  %2462 = vrcp.f32 %v921_v7  ;;  %v1717_v48 = vmul.f32 -1.442695, %v3238_v22 }
 0x147   :  { %v2445_v29 = vpop.eup %2444  ;;  %v3248_v6 = vmul.f32 %v2443_v25, %v3129_v60  ;;  %2464 = vrcp.f32 %v920_v32  ;;  %v2009_v8 = vpop.f32.mrb[56].mxu0  ;;  %v1716_v21 = vmul.f32 -1.442695, %v3241_v23 }
 0x148   :  { %v2447_v11 = vpop.eup %2446  ;;  %v923_v47 = vadd.f32 1.0, %v2445_v29  ;;  %2466 = vpow2.f32 %v1714_v46  ;;  %v3257_v53 = vadd.f32 %v3254_v3, %v2009_v8  ;;  %v643_v19 = vpop.f32.mrb[57].mxu0 }
 0x149   :  { %v2449_v31 = vpop.eup %2448  ;;  %v2174_v60 = vpack.c.bf16 %v3244_v54, %v3248_v6  ;;  %v922_v5 = vadd.f32 1.0, %v2447_v11  ;;  %2468 = vpow2.f32 %v1717_v48  ;;  %v3262_v42 = vadd.f32 %v3254_v3, %v643_v19 }
 0x14a   :  { %v2451_v14 = vpop.eup %2450  ;;  %v3265_v17 = vmul.f32 %v2449_v31, %v3136_v10  ;;  %2470 = vrcp.f32 %v923_v47  ;;  %v1719_v33 = vmul.f32 -1.442695, %v3257_v53  ;;  %v2530_v6 = vmov 0.0|0.0  }
 0x14b   :  { %v2453_v24 = vpop.eup %2452  ;;  %v3269_v57 = vmul.f32 %v2451_v14, %v3143_v26  ;;  %2472 = vrcp.f32 %v922_v5  ;;  %v2012_v27 = vpop.f32.mrb[58].mxu0  ;;  %v1718_v51 = vmul.f32 -1.442695, %v3262_v42  ;;  %2236 = vmatprep.subr.bf16.mxu0 %v2530_v6 }
 0x14c   :  { %v2455_v61 = vpop.eup %2454  ;;  %v925_v28 = vadd.f32 1.0, %v2453_v24  ;;  %2474 = vpow2.f32 %v1716_v21  ;;  %v3273_v34 = vadd.f32 %v3254_v3, %v2012_v27  ;;  %v653_v41 = vpop.f32.mrb[59].mxu0 }
 0x14d   :  { %v2457_v10 = vpop.eup %2456  ;;  %v2178_v43 = vpack.c.bf16 %v3265_v17, %v3269_v57  ;;  %v924_v46 = vadd.f32 1.0, %v2455_v61  ;;  %2476 = vpow2.f32 %v1719_v33  ;;  %v3278_v26 = vadd.f32 %v3254_v3, %v653_v41  ;;  %v1297_v17 = vld [vmem:[%s3541_s3 + $0x8] sm:$0xff]  ;;  %v1298_v57 = vld [vmem:[%s3541_s3 + $0x10] sm:$0xff] }
 0x14e   :  { %v2459_v40 = vpop.eup %2458  ;;  %v3281_v18 = vmul.f32 %v2457_v10, %v3149_v30  ;;  %2478 = vrcp.f32 %v925_v28  ;;  %v1721_v7 = vmul.f32 -1.442695, %v3273_v34 }
 0x14f   :  { %v2461_v58 = vpop.eup %2460  ;;  %2480 = vrcp.f32 %v924_v46  ;;  %v927_v36 = vadd.f32 1.0, %v2459_v40  ;;  %v1720_v32 = vmul.f32 -1.442695, %v3278_v26  ;;  %v2015_v25 = vpop.f32.mrb[60].mxu0 }
 0x150   :  { %v2463_v48 = vpop.eup %2462  ;;  %v3286_v29 = vmul.f32 %v2461_v58, %v3156_v55  ;;  %2482 = vpow2.f32 %v1718_v51  ;;  %v3289_v8 = vadd.f32 %v3254_v3, %v2015_v25  ;;  %v663_v11 = vpop.f32.mrb[61].mxu0 }
 0x151   :  { %v2465_v30 = vpop.eup %2464  ;;  %v3292_v47 = vmul.f32 %v2463_v48, %v3162_v2  ;;  %2484 = vrcp.f32 %v927_v36  ;;  %v3295_v21 = vadd.f32 %v3254_v3, %v663_v11 }
 0x152   :  { %v2467_v19 = vpop.eup %2466  ;;  %v2182_v31 = vpack.c.bf16 %v3281_v18, %v3286_v29  ;;  %v3300_v55 = vmul.f32 %v2465_v30, %v3168_v44  ;;  %2486 = vpow2.f32 %v1721_v7  ;;  %v1723_v5 = vmul.f32 -1.442695, %v3289_v8  ;;  %v1300_v18 = vld [vmem:[%s3541_s3 + $0x20] sm:$0xff]  ;;  %v1301_v29 = vld [vmem:[%s3541_s3 + $0x28] sm:$0xff] }
 0x153   :  { %v2469_v14 = vpop.eup %2468  ;;  %v926_v33 = vadd.f32 1.0, %v2467_v19  ;;  %2488 = vpow2.f32 %v1720_v32  ;;  %v1722_v2 = vmul.f32 -1.442695, %v3295_v21  ;;  %v2018_v24 = vpop.f32.mrb[62].mxu0 }
 0x154   :  { %v2471_v27 = vpop.eup %2470  ;;  %v2186_v61 = vpack.c.bf16 %v3292_v47, %v3300_v55  ;;  %v929_v28 = vadd.f32 1.0, %v2469_v14  ;;  %2490 = vpow2.f32 %v1723_v5  ;;  %v3307_v51 = vadd.f32 %v3254_v3, %v2018_v24  ;;  %v673_v44 = vpop.f32.mrb[63].mxu0  ;;  %v1302_v47 = vld [vmem:[%s3541_s3 + $0x30] sm:$0xff]  ;;  %v1304_v55 = vld [vmem:[%s3541_s3 + $0x40] sm:$0xff] }
 0x155   :  { %v2473_v41 = vpop.eup %2472  ;;  %v1115_v10 = vmul.f32 %v2471_v27, %v3182_v50  ;;  %2492 = vrcp.f32 %v926_v33  ;;  %v3311_v46 = vadd.f32 %v3254_v3, %v673_v44 }
 0x156   :  { %v2475_v40 = vpop.eup %2474  ;;  %v1114_v7 = vmul.f32 %v2473_v41, %v3190_v39  ;;  %2494 = vrcp.f32 %v929_v28  ;;  %v1725_v58 = vmul.f32 -1.442695, %v3307_v51 }
 0x157   :  { %v2477_v36 = vpop.eup %2476  ;;  %v928_v32 = vadd.f32 1.0, %v2475_v40  ;;  %2496 = vpow2.f32 %v1722_v2  ;;  %v1724_v25 = vmul.f32 -1.442695, %v3311_v46 }
 0x158   :  { %v2479_v48 = vpop.eup %2478  ;;  %v931_v11 = vadd.f32 1.0, %v2477_v36  ;;  %2498 = vpow2.f32 %v1725_v58  ;;  %v2156_v30 = vpack.c.bf16 %v1115_v10, %v1114_v7 }
 0x159   :  { %v2481_v50 = vpop.eup %2480  ;;  %v1117_v19 = vmul.f32 %v2479_v48, %v3201_v9  ;;  %2500 = vrcp.f32 %v928_v32 }
 0x15a   :  { %v2483_v3 = vpop.eup %2482  ;;  %v1116_v5 = vmul.f32 %v2481_v50, %v3209_v45  ;;  %2502 = vrcp.f32 %v931_v11  ;;  %2157 = vmatprep.subr.bf16.mxu1 %v2156_v30 }
 0x15b   :  { %v2485_v39 = vpop.eup %2484  ;;  %v930_v14 = vadd.f32 1.0, %v2483_v3  ;;  %2504 = vpow2.f32 %v1724_v25  ;;  %2159 = vmatpush3.bf16.msra.mxu1 %v2158_v56  ;;  %v1307_v3 = vld [vmem:[%s3541_s3 + $0x58] sm:$0xff] }
 0x15c   :  { %v2487_v33 = vpop.eup %2486  ;;  %v2160_v2 = vpack.c.bf16 %v1117_v19, %v1116_v5  ;;  %v1119_v9 = vmul.f32 %v2485_v39, %v3223_v49  ;;  %v1308_v39 = vld [vmem:[%s3541_s3 + $0x60] sm:$0xff] }
 0x15d   :  { %v2489_v24 = vpop.eup %2488  ;;  %2506 = vrcp.f32 %v930_v14  ;;  %v933_v27 = vadd.f32 1.0, %v2487_v33  ;;  %v1309_v14 = vld [vmem:[%s3541_s3 + $0x68] sm:$0xff] }
 0x15e   :  { %v2491_v28 = vpop.eup %2490  ;;  %v932_v44 = vadd.f32 1.0, %v2489_v24  ;;  %2161 = vmatprep.subr.bf16.mxu1 %v2160_v2  ;;  %v2207_v33 = vpack.c.bf16 %v1309_v14, %v1308_v39  ;;  %v1310_v2 = vld [vmem:[%s3541_s3 + $0x70] sm:$0xff]  ;;  %v1311_v24 = vld [vmem:[%s3541_s3 + $0x78] sm:$0xff] }
 0x15f   :  { %v2493_v45 = vpop.eup %2492  ;;  %2508 = vrcp.f32 %v933_v27  ;;  %v935_v41 = vadd.f32 1.0, %v2491_v28  ;;  %2163 = vmatpush3.bf16.msra.mxu1 %v2162_v59  ;;  %v2210_v27 = vpack.c.bf16 %v1311_v24, %v1310_v2  ;;  %v2532_v28 = vmov 0.0  }
 0x160   :  { %v2495_v10 = vpop.eup %2494  ;;  %v1118_v37 = vmul.f32 %v2493_v45, %v3228_v13  ;;  %2510 = vrcp.f32 %v932_v44  ;;  %2121 = vmatprep.mubr.msk.f32.mxu0 %vm2531_vm13, %v2532_v28 }
 0x161   :  { %v2497_v20 = vpop.eup %2496  ;;  %2512 = vrcp.f32 %v935_v41  ;;  %v1121_v40 = vmul.f32 %v2495_v10, %v3238_v22 }
 0x162   :  { %v2499_v56 = vpop.eup %2498  ;;  %v934_v7 = vadd.f32 1.0, %v2497_v20  ;;  %v2164_v49 = vpack.c.bf16 %v1119_v9, %v1118_v37 }
 0x163   :  { %v2501_v58 = vpop.eup %2500  ;;  %v937_v36 = vadd.f32 1.0, %v2499_v56  ;;  %v1396_v56 = vld [vmem:[%s3542_s5] sm:$0xff] }
 0x164   :  { %v2503_v32 = vpop.eup %2502  ;;  %v1120_v25 = vmul.f32 %v2501_v58, %v3241_v23  ;;  %2514 = vrcp.f32 %v934_v7  ;;  %2165 = vmatprep.subr.bf16.mxu1 %v2164_v49  ;;  %v1398_v49 = vld [vmem:[%s3542_s5 + $0x10] sm:$0xff]  ;;  %v1399_v58 = vld [vmem:[%s3542_s5 + $0x18] sm:$0xff] }
 0x165   :  { %v2505_v62 = vpop.eup %2504  ;;  %2516 = vrcp.f32 %v937_v36  ;;  %2167 = vmatpush3.bf16.msra.mxu1 %v2166_v15  ;;  %v1123_v38 = vmul.f32 %v2503_v32, %v3257_v53  ;;  %v2216_v36 = vpack.c.bf16 %v1399_v58, %v1398_v49  ;;  %v1400_v32 = vld [vmem:[%s3542_s5 + $0x20] sm:$0xff] }
 0x166   :  { %v936_v59 = vadd.f32 1.0, %v2505_v62  ;;  %v2168_v13 = vpack.c.bf16 %v1121_v40, %v1120_v25  ;;  %v1397_v40 = vld [vmem:[%s3542_s5 + $0x8] sm:$0xff]  ;;  %v1734_v49 = vld [vmem:[%s3546_s8] ss:$0 sm:$0xff] }
 0x167   :  { %v2507_v22 = vpop.eup %2506  ;;  %v2213_v7 = vpack.c.bf16 %v1397_v40, %v1396_v56  ;;  %v1401_v25 = vld [vmem:[%s3542_s5 + $0x28] sm:$0xff] }
 0x168   :  { %v1122_v48 = vmul.f32 %v2507_v22, %v3262_v42  ;;  %2518 = vrcp.f32 %v936_v59  ;;  %2169 = vmatprep.subr.bf16.mxu1 %v2168_v13  ;;  %v2219_v62 = vpack.c.bf16 %v1401_v25, %v1400_v32  ;;  %v1403_v59 = vld [vmem:[%s3542_s5 + $0x38] sm:$0xff]  ;;  %v1404_v22 = vld [vmem:[%s3542_s5 + $0x40] sm:$0xff] }
 0x169   :  { %v2509_v11 = vpop.eup %2508  ;;  %2171 = vmatpush3.bf16.msra.mxu1 %v2170_v12 }
 0x16a   :  { %v2511_v23 = vpop.eup %2510  ;;  %v1125_v30 = vmul.f32 %v2509_v11, %v3273_v34  ;;  %v2172_v50 = vpack.c.bf16 %v1123_v38, %v1122_v48  ;;  %v1402_v38 = vld [vmem:[%s3542_s5 + $0x30] sm:$0xff]  ;;  %v1405_v48 = vld [vmem:[%s3542_s5 + $0x48] sm:$0xff] }
 0x16b   :  { %v2513_v0 = vpop.eup %2512  ;;  %v1124_v35 = vmul.f32 %v2511_v23, %v3278_v26  ;;  %v2222_v13 = vpack.c.bf16 %v1403_v59, %v1402_v38  ;;  %v2225_v11 = vpack.c.bf16 %v1405_v48, %v1404_v22  ;;  %v1406_v23 = vld [vmem:[%s3542_s5 + $0x50] sm:$0xff] }
 0x16c   :  { %2173 = vmatprep.subr.bf16.mxu1 %v2172_v50  ;;  %v1127_v15 = vmul.f32 %v2513_v0, %v3289_v8  ;;  %v2195_v8 = vpack.c.bf16 %v1301_v29, %v1300_v18  ;;  %v1408_v0 = vld [vmem:[%s3542_s5 + $0x60] sm:$0xff]  ;;  %v1505_v29 = vld [vmem:[%s3543_s7 + $0x48] sm:$0xff] }
 0x16d   :  { %2175 = vmatpush3.bf16.msra.mxu1 %v2174_v60  ;;  %v2176_v53 = vpack.c.bf16 %v1125_v30, %v1124_v35  ;;  %v1296_v60 = vld [vmem:[%s3541_s3] sm:$0xff]  ;;  %v1407_v30 = vld [vmem:[%s3542_s5 + $0x58] sm:$0xff]  ;;  %v1409_v35 = vld [vmem:[%s3542_s5 + $0x68] sm:$0xff] }
 0x16e   :  { %v2515_v42 = vpop.eup %2514  ;;  %v2228_v50 = vpack.c.bf16 %v1407_v30, %v1406_v23  ;;  %v1504_v18 = vld [vmem:[%s3543_s7 + $0x40] sm:$0xff] }
 0x16f   :  { %v2517_v19 = vpop.eup %2516  ;;  %v1126_v1 = vmul.f32 %v2515_v42, %v3295_v21  ;;  %2177 = vmatprep.subr.bf16.mxu1 %v2176_v53  ;;  %v1303_v21 = vld [vmem:[%s3541_s3 + $0x38] sm:$0xff]  ;;  %v1410_v53 = vld [vmem:[%s3542_s5 + $0x70] sm:$0xff] }
 0x170   :  { %v1129_v52 = vmul.f32 %v2517_v19, %v3307_v51  ;;  %v1411_v42 = vld [vmem:[%s3542_s5 + $0x78] sm:$0xff] }
 0x171   :  { %2179 = vmatpush3.bf16.msra.mxu1 %v2178_v43  ;;  %v2180_v12 = vpack.c.bf16 %v1127_v15, %v1126_v1  ;;  %v2189_v43 = vpack.c.bf16 %v1297_v17, %v1296_v60  ;;  %v2231_v15 = vpack.c.bf16 %v1409_v35, %v1408_v0  ;;  %v2234_v19 = vpack.c.bf16 %v1411_v42, %v1410_v53  ;;  %v1496_v1 = vld [vmem:[%s3543_s7] sm:$0xff]  ;;  %v1501_v17 = vld [vmem:[%s3543_s7 + $0x28] sm:$0xff] }
 0x172   :  { %v2519_v34 = vpop.eup %2518  ;;  %v1500_v60 = vld [vmem:[%s3543_s7 + $0x20] sm:$0xff] }
 0x173   :  { %v1128_v26 = vmul.f32 %v2519_v34, %v3311_v46  ;;  %2181 = vmatprep.subr.bf16.mxu1 %v2180_v12  ;;  %v1306_v46 = vld [vmem:[%s3541_s3 + $0x50] sm:$0xff] }
 0x174   :  { %v2204_v5 = vpack.c.bf16 %v1307_v3, %v1306_v46  ;;  %v1498_v12 = vld [vmem:[%s3543_s7 + $0x10] sm:$0xff]  ;;  %v1730_v46 = vld [vmem:[%s3544_s4] ss:$0 sm:$0xff] }
 0x175   :  { %2183 = vmatpush3.bf16.msra.mxu1 %v2182_v31  ;;  %v2184_v54 = vpack.c.bf16 %v1129_v52, %v1128_v26  ;;  %v2198_v31 = vpack.c.bf16 %v1303_v21, %v1302_v47  ;;  %v1497_v52 = vld [vmem:[%s3543_s7 + $0x8] sm:$0xff]  ;;  %v1499_v26 = vld [vmem:[%s3543_s7 + $0x18] sm:$0xff]  ;;  %v1506_v47 = vld [vmem:[%s3543_s7 + $0x50] sm:$0xff] }
 0x176   :  { %v2237_v34 = vpack.c.bf16 %v1497_v52, %v1496_v1  ;;  %v1507_v21 = vld [vmem:[%s3543_s7 + $0x58] sm:$0xff] }
 0x177   :  { %2185 = vmatprep.subr.bf16.mxu1 %v2184_v54  ;;  %v2240_v54 = vpack.c.bf16 %v1499_v26, %v1498_v12 }
 0x178   :  { %2238 = vmatpush3.bf16.msra.mxu0 %v2237_v34 }
 0x179   :  { %2187 = vmatpush3.bf16.msra.mxu1 %v2186_v61  ;;  %v1305_v61 = vld [vmem:[%s3541_s3 + $0x48] sm:$0xff]  ;;  %2239 = vmatprep.subr.bf16.mxu0 %v2530_v6 }
 0x17a   :  { %2188 = vmatprep.subr.bf16.mxu1 %v2530_v6  ;;  %v2201_v51 = vpack.c.bf16 %v1305_v61, %v1304_v55  ;;  %v1508_v55 = vld [vmem:[%s3543_s7 + $0x60] sm:$0xff]  ;;  %v1509_v61 = vld [vmem:[%s3543_s7 + $0x68] sm:$0xff] }
 0x17c   :  { %1729 = vmatmul.mubr.msk.f32.vlgmr.msra.gmra.mrb[2].mxu1 %vm2976_vm12, %v2529_v16  ;;  %v1299_v16 = vld [vmem:[%s3541_s3 + $0x18] sm:$0xff]  ;;  %2241 = vmatpush3.bf16.msra.mxu0 %v2240_v54 }
 0x17d   :  { %2190 = vmatpush3.bf16.msra.mxu1 %v2189_v43  ;;  %v2192_v63 = vpack.c.bf16 %v1299_v16, %v1298_v57  ;;  %2051 = vmatprep.mubr.msk.f32.mxu1 %vm2531_vm13, %v2532_v28  ;;  %v2243_v57 = vpack.c.bf16 %v1501_v17, %v1500_v60  ;;  %v1502_v43 = vld [vmem:[%s3543_s7 + $0x30] sm:$0xff]  ;;  %v1503_v16 = vld [vmem:[%s3543_s7 + $0x38] sm:$0xff] }
 0x17e   :  { %2191 = vmatprep.subr.bf16.mxu1 %v2530_v6  ;;  %2242 = vmatprep.subr.bf16.mxu0 %v2530_v6 }
 0x180   :  { %2244 = vmatpush3.bf16.msra.mxu0 %v2243_v57 }
 0x181   :  { %2193 = vmatpush3.bf16.msra.mxu1 %v2192_v63  ;;  %v2246_v63 = vpack.c.bf16 %v1503_v16, %v1502_v43  ;;  %2245 = vmatprep.subr.bf16.mxu0 %v2530_v6 }
 0x182   :  { %2194 = vmatprep.subr.bf16.mxu1 %v2530_v6 }
 0x184   :  { %2247 = vmatpush3.bf16.msra.mxu0 %v2246_v63 }
 0x185   :  { %2196 = vmatpush3.bf16.msra.mxu1 %v2195_v8  ;;  %v2249_v8 = vpack.c.bf16 %v1505_v29, %v1504_v18  ;;  %2248 = vmatprep.subr.bf16.mxu0 %v2530_v6 }
 0x186   :  { %2197 = vmatprep.subr.bf16.mxu1 %v2530_v6 }
 0x188   :  { %2250 = vmatpush3.bf16.msra.mxu0 %v2249_v8 }
 0x189   :  { %2199 = vmatpush3.bf16.msra.mxu1 %v2198_v31  ;;  %v2252_v31 = vpack.c.bf16 %v1507_v21, %v1506_v47  ;;  %2251 = vmatprep.subr.bf16.mxu0 %v2530_v6 }
 0x18a   :  { %2200 = vmatprep.subr.bf16.mxu1 %v2530_v6 }
 0x18c   :  { %2253 = vmatpush3.bf16.msra.mxu0 %v2252_v31 }
 0x18d   :  { %2202 = vmatpush3.bf16.msra.mxu1 %v2201_v51  ;;  %v2255_v51 = vpack.c.bf16 %v1509_v61, %v1508_v55  ;;  %2254 = vmatprep.subr.bf16.mxu0 %v2530_v6 }
 0x18e   :  { %2203 = vmatprep.subr.bf16.mxu1 %v2530_v6 }
 0x190   :  { %2256 = vmatpush3.bf16.msra.mxu0 %v2255_v51 }
 0x191   :  { %2205 = vmatpush3.bf16.msra.mxu1 %v2204_v5  ;;  %2257 = vmatprep.subr.bf16.mxu0 %v2530_v6 }
 0x192   :  { %2206 = vmatprep.subr.bf16.mxu1 %v2530_v6 }
 0x195   :  { %2208 = vmatpush3.bf16.msra.mxu1 %v2207_v33 }
 0x196   :  { %2209 = vmatprep.subr.bf16.mxu1 %v2530_v6 }
 0x199   :  { %2211 = vmatpush3.bf16.msra.mxu1 %v2210_v27 }
 0x19a   :  { %2212 = vmatprep.subr.bf16.mxu1 %v2530_v6 }
 0x20f   :  { %v1832_v9 = vpop.f32.mrb[0].mxu1 }
 0x210   :  { %v1833_v44 = vpop.f32.mrb[1].mxu1 }
 0x211   :  { %v1834_v45 = vadd.f32 %v1833_v44, %v1832_v9  ;;  %v1732_v44 = vld [vmem:[%s3545_s6] ss:$0 sm:$0xff] }
 0x24f   :  { %v1867_v41 = vpop.f32.mrb[2].mxu1 }
 0x250   :  { %v1868_v10 = vpop.f32.mrb[3].mxu1 }
 0x251   :  { %v1869_v37 = vadd.f32 %v1868_v10, %v1867_v41 }
 0x253   :  { %v1293_v20 = vadd.f32 %v1869_v37, %v1834_v45 }
 0x255   :  { %2052 = vmatmul.mubr.f32.vlgmr.msra.gmra.mrb[4].mxu1 %v1293_v20 }
 0x256   :  { %2086 = vmatprep.mubr.msk.f32.mxu1 %vm2531_vm13, %v2532_v28  ;;  %2214 = vmatpush3.bf16.msra.mxu1 %v2213_v7  ;;  %v1510_v28 = vld [vmem:[%s3543_s7 + $0x70] sm:$0xff] }
 0x257   :  { %2215 = vmatprep.subr.bf16.mxu1 %v2530_v6 }
 0x25a   :  { %2217 = vmatpush3.bf16.msra.mxu1 %v2216_v36 }
 0x25b   :  { %2218 = vmatprep.subr.bf16.mxu1 %v2530_v6 }
 0x25e   :  { %2220 = vmatpush3.bf16.msra.mxu1 %v2219_v62 }
 0x25f   :  { %2221 = vmatprep.subr.bf16.mxu1 %v2530_v6 }
 0x262   :  { %2223 = vmatpush3.bf16.msra.mxu1 %v2222_v13 }
 0x263   :  { %2224 = vmatprep.subr.bf16.mxu1 %v2530_v6 }
 0x266   :  { %2226 = vmatpush3.bf16.msra.mxu1 %v2225_v11 }
 0x267   :  { %2227 = vmatprep.subr.bf16.mxu1 %v2530_v6 }
 0x26a   :  { %2229 = vmatpush3.bf16.msra.mxu1 %v2228_v50 }
 0x26b   :  { %2230 = vmatprep.subr.bf16.mxu1 %v2530_v6 }
 0x26e   :  { %2232 = vmatpush3.bf16.msra.mxu1 %v2231_v15 }
 0x26f   :  { %2233 = vmatprep.subr.bf16.mxu1 %v2530_v6  ;;  %v1511_v6 = vld [vmem:[%s3543_s7 + $0x78] sm:$0xff] }
 0x270   :  { %v2258_v9 = vpack.c.bf16 %v1511_v6, %v1510_v28 }
 0x272   :  { %2235 = vmatpush3.bf16.msra.mxu1 %v2234_v19  ;;  %2259 = vmatpush3.bf16.msra.mxu0 %v2258_v9 }
 0x328   :  { %v1385_v3 = vpop.f32.mrb[4].mxu1 }
 0x329   :  { %v1386_v5 = vadd.f32 %v1730_v46, %v1385_v3  ;;  %v2053_v39 = vpop.f32.mrb[5].mxu1 }
 0x32b   :  { %v1731_v14 = vmul.f32 -1.442695, %v1386_v5 }
 0x32d   :  { %2520 = vpow2.f32 %v1731_v14 }
 0x337   :  { %v2521_v33 = vpop.eup %2520 }
 0x338   :  { %v1392_v2 = vadd.f32 1.0, %v2521_v33 }
 0x33a   :  { %2522 = vrcp.f32 %v1392_v2 }
 0x344   :  { %v2523_v24 = vpop.eup %2522 }
 0x345   :  { %v1395_v27 = vmul.f32 %v2523_v24, %v1386_v5 }
 0x347   :  { %2087 = vmatmul.mubr.f32.vlgmr.msra.gmra.mrb[6].mxu1 %v1395_v27 }
 0x41a   :  { %v1485_v45 = vpop.f32.mrb[6].mxu1 }
 0x41b   :  { %v1486_v41 = vadd.f32 %v1732_v44, %v1485_v45  ;;  %v2088_v10 = vpop.f32.mrb[7].mxu1 }
 0x41d   :  { %v1733_v37 = vmul.f32 -1.442695, %v1486_v41 }
 0x41f   :  { %2524 = vpow2.f32 %v1733_v37 }
 0x429   :  { %v2525_v20 = vpop.eup %2524 }
 0x42a   :  { %v1492_v56 = vadd.f32 1.0, %v2525_v20 }
 0x42c   :  { %2526 = vrcp.f32 %v1492_v56 }
 0x436   :  { %v2527_v40 = vpop.eup %2526 }
 0x437   :  { %v1495_v7 = vmul.f32 %v2527_v40, %v1486_v41 }
 0x439   :  { %2122 = vmatmul.mubr.f32.vlgmr.msra.gmra.mrb[64].mxu0 %v1495_v7 }
 0x50c   :  { %v1585_v58 = vpop.f32.mrb[64].mxu0 }
 0x50d   :  { %v1586_v36 = vadd.f32 %v1734_v49, %v1585_v58  ;;  %v2123_v32 = vpop.f32.mrb[65].mxu0 }
 0x50f   :  { %v1590_v25 = vmax.f32 %v1586_v36, 0.0 }
 0x511   :  { %v1591_v62 = vsel %vm1589_vm14, %v1590_v25, %v1586_v36 }
 0x512   :  { %1592 = vst [vmem:[%s3547_s9] sm:$0xff] %v1591_v62 }

</bundles_post_ra>
